<compile_context>
chip_gen: v5e
topology: v5e:2x2
jax: 0.10.0
libtpu: 0.0.40
codegen_flags: <defaults>
</compile_context>

<pallas_src>
import functools

import jax
import jax.numpy as jnp
from jax.experimental import pallas as pl
from jax.experimental.pallas import tpu as pltpu


def fire_kernel(x_ref, wsq_ref, sqv_ref, wbig_ref, ev_ref, out_ref, hp_ref, *, H, W):
    # x_ref block: (1, H*W, Cin) bf16
    S = wsq_ref.shape[1]
    E = wbig_ref.shape[1]          # E = E1 + E3

    # ---- squeeze1x1: 1x1 conv (bf16 MXU, f32 acc) -> ReLU -> BN scale/shift ----
    sqv = sqv_ref[...]                                     # (3, S) f32: bias/scale/shift
    z = jnp.dot(x_ref[0], wsq_ref[...], preferred_element_type=jnp.float32)
    h = jnp.maximum(z + sqv[0:1, :], 0.0) * sqv[1:2, :] + sqv[2:3, :]   # (H*W, S) f32

    # ---- halo scratch: zero the 1-px border (every step: scratch is per-core
    #      under megacore sharding), write h into the interior ----
    hp_ref[0:1, :, :] = jnp.zeros((1, W + 2, S), jnp.float32)
    hp_ref[H + 1:H + 2, :, :] = jnp.zeros((1, W + 2, S), jnp.float32)
    hp_ref[:, 0:1, :] = jnp.zeros((H + 2, 1, S), jnp.float32)
    hp_ref[:, W + 1:W + 2, :] = jnp.zeros((H + 2, 1, S), jnp.float32)
    hp_ref[1:H + 1, 1:W + 1, :] = h.reshape(H, W, S)

    # ---- fused expand: im2col the 9 taps -> one matmul with K=9*S, N=E1+E3.
    #      The center tap's weight rows also carry the expand1x1 weights.
    #      Taps cast to bf16 before the concatenate (half the copy traffic). ----
    hp = hp_ref[...]                                       # (H+2, W+2, S) f32
    taps = [hp[dy:dy + H, dx:dx + W, :].astype(jnp.bfloat16)
            for dy in range(3) for dx in range(3)]
    patches = jnp.concatenate(taps, axis=-1).reshape(H * W, 9 * S)
    ze = jnp.dot(patches, wbig_ref[...], preferred_element_type=jnp.float32)

    ev = ev_ref[...]                                       # (3, E) f32: bias/scale/shift
    e = jnp.maximum(ze + ev[0:1, :], 0.0) * ev[1:2, :] + ev[2:3, :]
    out_ref[0] = e.astype(out_ref.dtype)                   # (H*W, E)


@jax.jit
def fire_forward(x_nchw, params):
    """Fire forward. x_nchw: (N, Cin, H, W) float32. Returns (N, E1+E3, H, W) float32."""
    (wsq, bsq, ssq, tsq, we1, be1, se1, te1, we3, be3, se3, te3) = params
    N, Cin, H, W = x_nchw.shape
    S = wsq.shape[1]
    E1 = we1.shape[1]
    E3 = we3.shape[2]
    E = E1 + E3

    # NHWC -> flattened (N, H*W, Cin), bf16 activations for the MXU
    # (f32 accumulation inside the kernel).
    x = jnp.transpose(x_nchw, (0, 2, 3, 1)).astype(jnp.bfloat16).reshape(N, H * W, Cin)

    # Fused expand weight (9*S, E1+E3): rows of tap k hold the 3x3 weights in the
    # E3 columns; the center tap (k=4) additionally holds the 1x1 expand weights
    # in the E1 columns (other taps' E1 columns are zero).
    wbig = jnp.zeros((9, S, E), jnp.float32)
    wbig = wbig.at[:, :, E1:].set(we3)
    wbig = wbig.at[4, :, :E1].set(we1)
    wbig = wbig.reshape(9 * S, E).astype(jnp.bfloat16)

    wsq_b = wsq.astype(jnp.bfloat16)

    # Packed per-channel vectors: rows = [conv bias, BN scale, BN shift].
    sqv = jnp.concatenate([bsq, ssq, tsq], axis=0)                       # (3, S)
    ev = jnp.concatenate([jnp.concatenate([be1, be3], axis=1),
                          jnp.concatenate([se1, se3], axis=1),
                          jnp.concatenate([te1, te3], axis=1)], axis=0)  # (3, E)

    kernel = functools.partial(fire_kernel, H=H, W=W)
    out = pl.pallas_call(
        kernel,
        out_shape=jax.ShapeDtypeStruct((N, H * W, E), jnp.float32),
        grid=(N,),
        in_specs=[
            pl.BlockSpec((1, H * W, Cin), lambda n: (n, 0, 0)),
            pl.BlockSpec((Cin, S), lambda n: (0, 0)),
            pl.BlockSpec((3, S), lambda n: (0, 0)),
            pl.BlockSpec((9 * S, E), lambda n: (0, 0)),
            pl.BlockSpec((3, E), lambda n: (0, 0)),
        ],
        out_specs=pl.BlockSpec((1, H * W, E), lambda n: (n, 0, 0)),
        scratch_shapes=[pltpu.VMEM((H + 2, W + 2, S), jnp.float32)],
        compiler_params=pltpu.CompilerParams(
            dimension_semantics=("parallel",),
            vmem_limit_bytes=32 * 1024 * 1024),
    )(x, wsq_b, sqv, wbig, ev)

    # torch.cat(dim=1) already realized inside the kernel (channel-last slab);
    # reshape/transpose back to the module's NCHW convention.
    out = out.reshape(N, H, W, E)
    return jnp.transpose(out, (0, 3, 1, 2))


def fire_reference(x_nchw, params):
    """Pure-JAX f32 reference (NHWC math) for correctness check."""
    (wsq, bsq, ssq, tsq, we1, be1, se1, te1, we3, be3, se3, te3) = params
    x = jnp.transpose(x_nchw, (0, 2, 3, 1)).astype(jnp.float32)
    N, H, W, _ = x.shape
    h = jnp.maximum(jnp.einsum('nhwc,cs->nhws', x, wsq) + bsq[0], 0.0)
    h = h * ssq[0] + tsq[0]
    e1 = jnp.maximum(jnp.einsum('nhws,se->nhwe', h, we1) + be1[0], 0.0)
    e1 = e1 * se1[0] + te1[0]
    hp = jnp.pad(h, ((0, 0), (1, 1), (1, 1), (0, 0)))
    acc = jnp.zeros((N, H, W, we3.shape[2]), jnp.float32)
    for ky in range(3):
        for kx in range(3):
            acc = acc + jnp.einsum('nhws,se->nhwe',
                                   hp[:, ky:ky + H, kx:kx + W, :], we3[ky * 3 + kx])
    e3 = jnp.maximum(acc + be3[0], 0.0) * se3[0] + te3[0]
    out = jnp.concatenate([e1, e3], axis=-1)
    return jnp.transpose(out, (0, 3, 1, 2))


def make_params(key, in_ch, s1x1, e1x1, e3x3, eps=1e-5):
    """Deterministic synthetic Conv + BatchNorm(eval) params, folded to scale/shift."""
    ks = jax.random.split(key, 16)

    def bn(k, c):
        k1, k2, k3, k4 = jax.random.split(k, 4)
        gamma = 1.0 + 0.1 * jax.random.normal(k1, (c,), jnp.float32)
        beta = 0.1 * jax.random.normal(k2, (c,), jnp.float32)
        mean = 0.1 * jax.random.normal(k3, (c,), jnp.float32)
        var = 0.5 + jnp.abs(jax.random.normal(k4, (c,), jnp.float32))
        scale = gamma / jnp.sqrt(var + eps)
        shift = beta - mean * scale
        return scale.reshape(1, c), shift.reshape(1, c)

    # squeeze1x1: torch weight (s1x1, in_ch, 1, 1) -> (in_ch, s1x1)
    wsq = 0.2 * jax.random.normal(ks[0], (in_ch, s1x1), jnp.float32)
    bsq = 0.1 * jax.random.normal(ks[1], (1, s1x1), jnp.float32)
    ssq, tsq = bn(ks[2], s1x1)

    # expand1x1: torch weight (e1x1, s1x1, 1, 1) -> (s1x1, e1x1)
    we1 = 0.2 * jax.random.normal(ks[3], (s1x1, e1x1), jnp.float32)
    be1 = 0.1 * jax.random.normal(ks[4], (1, e1x1), jnp.float32)
    se1, te1 = bn(ks[5], e1x1)

    # expand3x3: torch weight (e3x3, s1x1, 3, 3) -> (3, 3, s1x1, e3x3) -> (9, s1x1, e3x3)
    w33 = 0.2 * jax.random.normal(ks[6], (e3x3, s1x1, 3, 3), jnp.float32)
    we3 = jnp.transpose(w33, (2, 3, 1, 0)).reshape(9, s1x1, e3x3)
    be3 = 0.1 * jax.random.normal(ks[7], (1, e3x3), jnp.float32)
    se3, te3 = bn(ks[8], e3x3)

    return (wsq, bsq, ssq, tsq, we1, be1, se1, te1, we3, be3, se3, te3)


if __name__ == "__main__":
    key = jax.random.PRNGKey(0)
    kx, kp = jax.random.split(key)

    N, in_ch, H, W = 2, 4, 16, 16
    s1x1, e1x1, e3x3 = 8, 16, 16

    x = jax.random.normal(kx, (N, in_ch, H, W), jnp.float32)
    params = make_params(kp, in_ch, s1x1, e1x1, e3x3)

    out = jax.block_until_ready(fire_forward(x, params))
    ref = jax.block_until_ready(fire_reference(x, params))

    assert out.shape == (N, e1x1 + e3x3, H, W), out.shape
    # bf16 matmuls (f32 accumulation) vs f32 reference -> loose tolerance.
    max_err = jnp.max(jnp.abs(out - ref))
    assert jnp.allclose(out, ref, atol=5e-2, rtol=5e-2), f"max abs err {max_err}"

    print("KERNEL_OK")
</pallas_src>

<mosaic_0001>
module attributes {stable_mosaic.version = 11 : i64} {
  func.func @fire_kernel(%arg0: i32, %arg1: memref<1x256x4xbf16, #tpu.memory_space<vmem>>, %arg2: memref<4x8xbf16, #tpu.memory_space<vmem>>, %arg3: memref<3x8xf32, #tpu.memory_space<vmem>>, %arg4: memref<72x32xbf16, #tpu.memory_space<vmem>>, %arg5: memref<3x32xf32, #tpu.memory_space<vmem>>, %arg6: memref<1x256x32xf32, #tpu.memory_space<vmem>>, %arg7: memref<18x18x8xf32, #tpu.memory_space<vmem>>) attributes {dimension_semantics = [#tpu.dimension_semantics<parallel>], iteration_bounds = array<i64: 2>, scalar_prefetch = 0 : i64, scratch_operands = 1 : i64, tpu.core_type = #tpu.core_type<tc>, window_params = [{transform_indices = @transform_0, window_bounds = array<i64: 1, 256, 4>}, {pipeline_mode = #tpu.pipeline_mode<synchronous>, transform_indices = @transform_1, window_bounds = array<i64: 4, 8>}, {pipeline_mode = #tpu.pipeline_mode<synchronous>, transform_indices = @transform_2, window_bounds = array<i64: 3, 8>}, {pipeline_mode = #tpu.pipeline_mode<synchronous>, transform_indices = @transform_3, window_bounds = array<i64: 72, 32>}, {pipeline_mode = #tpu.pipeline_mode<synchronous>, transform_indices = @transform_4, window_bounds = array<i64: 3, 32>}, {transform_indices = @transform_5, window_bounds = array<i64: 1, 256, 32>}]} {
    %c0 = arith.constant 0 : index
    %c0_0 = arith.constant 0 : index
    %0 = vector.load %arg3[%c0, %c0_0] : memref<3x8xf32, #tpu.memory_space<vmem>>, vector<3x8xf32>
    %c0_1 = arith.constant 0 : index
    %c0_2 = arith.constant 0 : index
    %c0_3 = arith.constant 0 : index
    %1 = vector.load %arg1[%c0_1, %c0_2, %c0_3] : memref<1x256x4xbf16, #tpu.memory_space<vmem>>, vector<1x256x4xbf16>
    %2 = vector.shape_cast %1 : vector<1x256x4xbf16> to vector<256x4xbf16>
    %c0_4 = arith.constant 0 : index
    %c0_5 = arith.constant 0 : index
    %3 = vector.load %arg2[%c0_4, %c0_5] : memref<4x8xbf16, #tpu.memory_space<vmem>>, vector<4x8xbf16>
    %cst = arith.constant dense<0.000000e+00> : vector<256x8xf32>
    %4 = tpu.matmul %2, %3, %cst {dimension_numbers = #tpu.dot_dimension_numbers<[1], [0], [0], [1], [0, 0, 1, 1], [], []>} : vector<256x4xbf16>, vector<4x8xbf16>, vector<256x8xf32> -> vector<256x8xf32>
    %5 = vector.extract_strided_slice %0 {offsets = [0, 0], sizes = [1, 8], strides = [1, 1]} : vector<3x8xf32> to vector<1x8xf32>
    %6 = vector.broadcast %5 : vector<1x8xf32> to vector<256x8xf32>
    %7 = arith.addf %4, %6 : vector<256x8xf32>
    %cst_6 = arith.constant 0.000000e+00 : f32
    %8 = vector.broadcast %cst_6 : f32 to vector<256x8xf32>
    %9 = arith.maximumf %7, %8 : vector<256x8xf32>
    %10 = vector.extract_strided_slice %0 {offsets = [1, 0], sizes = [1, 8], strides = [1, 1]} : vector<3x8xf32> to vector<1x8xf32>
    %11 = vector.broadcast %10 : vector<1x8xf32> to vector<256x8xf32>
    %12 = arith.mulf %9, %11 : vector<256x8xf32>
    %13 = vector.extract_strided_slice %0 {offsets = [2, 0], sizes = [1, 8], strides = [1, 1]} : vector<3x8xf32> to vector<1x8xf32>
    %14 = vector.broadcast %13 : vector<1x8xf32> to vector<256x8xf32>
    %15 = arith.addf %12, %14 : vector<256x8xf32>
    %cst_7 = arith.constant 0.000000e+00 : f32
    %16 = vector.broadcast %cst_7 : f32 to vector<1x18x8xf32>
    %c0_8 = arith.constant 0 : index
    %c0_9 = arith.constant 0 : index
    %c0_10 = arith.constant 0 : index
    %17 = vector.load %arg7[%c0_8, %c0_9, %c0_10] : memref<18x18x8xf32, #tpu.memory_space<vmem>>, vector<1x18x8xf32>
    tpu.vector_store %arg7[%c0_8, %c0_9, %c0_10], %16 {strides = array<i32>} : memref<18x18x8xf32, #tpu.memory_space<vmem>>, vector<1x18x8xf32>,
    %cst_11 = arith.constant 0.000000e+00 : f32
    %18 = vector.broadcast %cst_11 : f32 to vector<1x18x8xf32>
    %c17 = arith.constant 17 : index
    %c0_12 = arith.constant 0 : index
    %c0_13 = arith.constant 0 : index
    %19 = vector.load %arg7[%c17, %c0_12, %c0_13] : memref<18x18x8xf32, #tpu.memory_space<vmem>>, vector<1x18x8xf32>
    tpu.vector_store %arg7[%c17, %c0_12, %c0_13], %18 {strides = array<i32>} : memref<18x18x8xf32, #tpu.memory_space<vmem>>, vector<1x18x8xf32>,
    %cst_14 = arith.constant 0.000000e+00 : f32
    %20 = vector.broadcast %cst_14 : f32 to vector<18x1x8xf32>
    %c0_15 = arith.constant 0 : index
    %c0_16 = arith.constant 0 : index
    %c0_17 = arith.constant 0 : index
    %21 = vector.load %arg7[%c0_15, %c0_16, %c0_17] : memref<18x18x8xf32, #tpu.memory_space<vmem>>, vector<18x1x8xf32>
    tpu.vector_store %arg7[%c0_15, %c0_16, %c0_17], %20 {strides = array<i32>} : memref<18x18x8xf32, #tpu.memory_space<vmem>>, vector<18x1x8xf32>,
    %cst_18 = arith.constant 0.000000e+00 : f32
    %22 = vector.broadcast %cst_18 : f32 to vector<18x1x8xf32>
    %c0_19 = arith.constant 0 : index
    %c17_20 = arith.constant 17 : index
    %c0_21 = arith.constant 0 : index
    %23 = vector.load %arg7[%c0_19, %c17_20, %c0_21] : memref<18x18x8xf32, #tpu.memory_space<vmem>>, vector<18x1x8xf32>
    tpu.vector_store %arg7[%c0_19, %c17_20, %c0_21], %22 {strides = array<i32>} : memref<18x18x8xf32, #tpu.memory_space<vmem>>, vector<18x1x8xf32>,
    %24 = vector.shape_cast %15 : vector<256x8xf32> to vector<16x16x8xf32>
    %c1 = arith.constant 1 : index
    %c1_22 = arith.constant 1 : index
    %c0_23 = arith.constant 0 : index
    %25 = vector.load %arg7[%c1, %c1_22, %c0_23] : memref<18x18x8xf32, #tpu.memory_space<vmem>>, vector<16x16x8xf32>
    tpu.vector_store %arg7[%c1, %c1_22, %c0_23], %24 {strides = array<i32>} : memref<18x18x8xf32, #tpu.memory_space<vmem>>, vector<16x16x8xf32>,
    %c0_24 = arith.constant 0 : index
    %c0_25 = arith.constant 0 : index
    %c0_26 = arith.constant 0 : index
    %26 = vector.load %arg7[%c0_24, %c0_25, %c0_26] : memref<18x18x8xf32, #tpu.memory_space<vmem>>, vector<18x18x8xf32>
    %27 = vector.extract_strided_slice %26 {offsets = [0, 0, 0], sizes = [16, 16, 8], strides = [1, 1, 1]} : vector<18x18x8xf32> to vector<16x16x8xf32>
    %28 = arith.truncf %27 : vector<16x16x8xf32> to vector<16x16x8xbf16>
    %29 = vector.extract_strided_slice %26 {offsets = [0, 1, 0], sizes = [16, 16, 8], strides = [1, 1, 1]} : vector<18x18x8xf32> to vector<16x16x8xf32>
    %30 = arith.truncf %29 : vector<16x16x8xf32> to vector<16x16x8xbf16>
    %31 = vector.extract_strided_slice %26 {offsets = [0, 2, 0], sizes = [16, 16, 8], strides = [1, 1, 1]} : vector<18x18x8xf32> to vector<16x16x8xf32>
    %32 = arith.truncf %31 : vector<16x16x8xf32> to vector<16x16x8xbf16>
    %33 = vector.extract_strided_slice %26 {offsets = [1, 0, 0], sizes = [16, 16, 8], strides = [1, 1, 1]} : vector<18x18x8xf32> to vector<16x16x8xf32>
    %34 = arith.truncf %33 : vector<16x16x8xf32> to vector<16x16x8xbf16>
    %35 = vector.extract_strided_slice %26 {offsets = [1, 1, 0], sizes = [16, 16, 8], strides = [1, 1, 1]} : vector<18x18x8xf32> to vector<16x16x8xf32>
    %36 = arith.truncf %35 : vector<16x16x8xf32> to vector<16x16x8xbf16>
    %37 = vector.extract_strided_slice %26 {offsets = [1, 2, 0], sizes = [16, 16, 8], strides = [1, 1, 1]} : vector<18x18x8xf32> to vector<16x16x8xf32>
    %38 = arith.truncf %37 : vector<16x16x8xf32> to vector<16x16x8xbf16>
    %39 = vector.extract_strided_slice %26 {offsets = [2, 0, 0], sizes = [16, 16, 8], strides = [1, 1, 1]} : vector<18x18x8xf32> to vector<16x16x8xf32>
    %40 = arith.truncf %39 : vector<16x16x8xf32> to vector<16x16x8xbf16>
    %41 = vector.extract_strided_slice %26 {offsets = [2, 1, 0], sizes = [16, 16, 8], strides = [1, 1, 1]} : vector<18x18x8xf32> to vector<16x16x8xf32>
    %42 = arith.truncf %41 : vector<16x16x8xf32> to vector<16x16x8xbf16>
    %43 = vector.extract_strided_slice %26 {offsets = [2, 2, 0], sizes = [16, 16, 8], strides = [1, 1, 1]} : vector<18x18x8xf32> to vector<16x16x8xf32>
    %44 = arith.truncf %43 : vector<16x16x8xf32> to vector<16x16x8xbf16>
    %45 = tpu.concatenate %28, %30, %32, %34, %36, %38, %40, %42, %44 in 2 : vector<16x16x8xbf16>, vector<16x16x8xbf16>, vector<16x16x8xbf16>, vector<16x16x8xbf16>, vector<16x16x8xbf16>, vector<16x16x8xbf16>, vector<16x16x8xbf16>, vector<16x16x8xbf16>, vector<16x16x8xbf16> -> vector<16x16x72xbf16>
    %46 = vector.shape_cast %45 : vector<16x16x72xbf16> to vector<256x72xbf16>
    %c0_27 = arith.constant 0 : index
    %c0_28 = arith.constant 0 : index
    %47 = vector.load %arg4[%c0_27, %c0_28] : memref<72x32xbf16, #tpu.memory_space<vmem>>, vector<72x32xbf16>
    %cst_29 = arith.constant dense<0.000000e+00> : vector<256x32xf32>
    %48 = tpu.matmul %46, %47, %cst_29 {dimension_numbers = #tpu.dot_dimension_numbers<[1], [0], [0], [1], [0, 0, 1, 1], [], []>} : vector<256x72xbf16>, vector<72x32xbf16>, vector<256x32xf32> -> vector<256x32xf32>
    %c0_30 = arith.constant 0 : index
    %c0_31 = arith.constant 0 : index
    %49 = vector.load %arg5[%c0_30, %c0_31] : memref<3x32xf32, #tpu.memory_space<vmem>>, vector<3x32xf32>
    %50 = vector.extract_strided_slice %49 {offsets = [0, 0], sizes = [1, 32], strides = [1, 1]} : vector<3x32xf32> to vector<1x32xf32>
    %51 = vector.broadcast %50 : vector<1x32xf32> to vector<256x32xf32>
    %52 = arith.addf %48, %51 : vector<256x32xf32>
    %cst_32 = arith.constant 0.000000e+00 : f32
    %53 = vector.broadcast %cst_32 : f32 to vector<256x32xf32>
    %54 = arith.maximumf %52, %53 : vector<256x32xf32>
    %55 = vector.extract_strided_slice %49 {offsets = [1, 0], sizes = [1, 32], strides = [1, 1]} : vector<3x32xf32> to vector<1x32xf32>
    %56 = vector.broadcast %55 : vector<1x32xf32> to vector<256x32xf32>
    %57 = arith.mulf %54, %56 : vector<256x32xf32>
    %58 = vector.extract_strided_slice %49 {offsets = [2, 0], sizes = [1, 32], strides = [1, 1]} : vector<3x32xf32> to vector<1x32xf32>
    %59 = vector.broadcast %58 : vector<1x32xf32> to vector<256x32xf32>
    %60 = arith.addf %57, %59 : vector<256x32xf32>
    %c0_33 = arith.constant 0 : index
    %c0_34 = arith.constant 0 : index
    %c0_35 = arith.constant 0 : index
    %61 = vector.load %arg6[%c0_33, %c0_34, %c0_35] : memref<1x256x32xf32, #tpu.memory_space<vmem>>, vector<1x256x32xf32>
    %62 = vector.shape_cast %61 : vector<1x256x32xf32> to vector<256x32xf32>
    %63 = vector.shape_cast %60 : vector<256x32xf32> to vector<1x256x32xf32>
    tpu.vector_store %arg6[%c0_33, %c0_34, %c0_35], %63 {strides = array<i32>} : memref<1x256x32xf32, #tpu.memory_space<vmem>>, vector<1x256x32xf32>,
    return
  }
  func.func @transform_0(%arg0: i32) -> (i32, i32, i32) {
    %c0_i32 = arith.constant 0 : i32
    %c0_i32_0 = arith.constant 0 : i32
    %c0_i32_1 = arith.constant 0 : i32
    return %arg0, %c0_i32, %c0_i32_0 : i32, i32, i32
  }
  func.func @transform_1(%arg0: i32) -> (i32, i32) {
    %c0_i32 = arith.constant 0 : i32
    %c0_i32_0 = arith.constant 0 : i32
    %c0_i32_1 = arith.constant 0 : i32
    return %c0_i32, %c0_i32_0 : i32, i32
  }
  func.func @transform_2(%arg0: i32) -> (i32, i32) {
    %c0_i32 = arith.constant 0 : i32
    %c0_i32_0 = arith.constant 0 : i32
    %c0_i32_1 = arith.constant 0 : i32
    return %c0_i32, %c0_i32_0 : i32, i32
  }
  func.func @transform_3(%arg0: i32) -> (i32, i32) {
    %c0_i32 = arith.constant 0 : i32
    %c0_i32_0 = arith.constant 0 : i32
    %c0_i32_1 = arith.constant 0 : i32
    return %c0_i32, %c0_i32_0 : i32, i32
  }
  func.func @transform_4(%arg0: i32) -> (i32, i32) {
    %c0_i32 = arith.constant 0 : i32
    %c0_i32_0 = arith.constant 0 : i32
    %c0_i32_1 = arith.constant 0 : i32
    return %c0_i32, %c0_i32_0 : i32, i32
  }
  func.func @transform_5(%arg0: i32) -> (i32, i32, i32) {
    %c0_i32 = arith.constant 0 : i32
    %c0_i32_0 = arith.constant 0 : i32
    %c0_i32_1 = arith.constant 0 : i32
    return %arg0, %c0_i32, %c0_i32_0 : i32, i32, i32
  }
}

</mosaic_0001>

<bundles_post_ra>
// kernel: fire_forward.1
= control target key start
LH: loop header
LB: loop body
LE: loop exit
PB: predicated region body
PF: predicated region fallthrough
CT: control target
= control target key end

     0   :  { %10 = vsyncpa [#allocation4], 0  ;;  %s3621_s0 = inlined_call_operand.vmem [shape: bf16[2,256,4], index: 0, kind: input, shape index: {}]   ;;  %s3622_s1 = inlined_call_operand.vmem [shape: bf16[4,8], index: 1, kind: input, shape index: {}]   ;;  %s3623_s2 = inlined_call_operand.vmem [shape: f32[3,8], index: 2, kind: input, shape index: {}]   ;;  %s3624_s3 = inlined_call_operand.vmem [shape: bf16[72,32], index: 3, kind: input, shape index: {}]   ;;  %s3625_s4 = inlined_call_operand.vmem [shape: f32[3,32], index: 4, kind: input, shape index: {}]   ;;  %s3626_s5 = inlined_call_operand.hbm [shape: f32[2,256,32], index: 5, kind: output, shape index: {}]  }
   0x1   :  { %12 = vsyncpa [#allocation4 + $0x1], 0  ;;  %s2378_s18 = smov 0   ;;  %s2380_s19 = smov 0  }
   0x2   :  { %s2382_s20 = smov 0   ;;  %s2384_s21 = smov 0  }
   0x3 LB: > { %s2399_s22 = sadd.s32 4294967295, %s2336_s21   ;;  %s2073_s23 = sadd.s32 4294967294, %s2336_s21   ;;  %s2336_s21 = sphi %s2384_s21, %s3635_s21   ;;  %s2332_s20 = sphi %s2382_s20, %s3634_s20   ;;  %s2328_s19 = sphi %s2380_s19, %s3633_s19   ;;  %s2324_s18 = sphi %s2378_s18, %s3632_s18  }
   0x4   : > { %s2403_s24 = sadd.s32 1, %s2336_s21   ;;  %s135_s25 = sadd.s32 1, %s2332_s20 }
   0x5   : > { %s132_s26 = ssub.s32 %s2336_s21, %s2403_s24  ;;  %p145_p0 = scmp.ne.s32.totalorder %s2332_s20, %s2328_s19 }
   0x6   : > { %p133_p1 = scmp.eq.s32.totalorder %s132_s26, 0  ;;  %p146_p2 = scmp.eq.s32.totalorder %s2399_s22, 1 }
   0x7   : > { %p151_p3 = scmp.ne.s32.totalorder %s2328_s19, %s2324_s18  ;;  %p152_p4 = scmp.eq.s32.totalorder %s2073_s23, 1 }
   0x8   : > { %s2414_s27 = scalar_select %p133_p1, %s2332_s20, %s135_s25  }
   0x9   : > { %p2416_p5 = por %p146_p2, %p145_p0  ;;  %p2420_p6 = por %p152_p4, %p151_p3 }
   0xa   : > { %p2076_p7 = scmp.ge.s32.totalorder %s2336_s21, 1  ;;  %p190_p8 = scmp.lt.s32.totalorder %s2336_s21, 3 }
   0xc   : > { %p191_p9 = pnand %p2076_p7, %p190_p8 }
   0xe   : > { %194 = sbr.rel (%p191_p9) target bundleno = 780 (0x30c), region = 40 }
  0x13   : > { %v257_v0 = vld [vmem:[%s3622_s1] sm:$0x3]  ;;  %vm388_vm0 = vcmask 1041408   ;;  %p218_p10 = scmp.lt.s32.totalorder %s2399_s22, 1  ;;  %vm339_vm1 = vcmask 31744   ;;  %vm579_vm2 = vcmask 64512  }
  0x14   : > { %v390_v1 = vsel %vm388_vm0, %v257_v0, 0  ;;  %v2338_v11 = vmov 0.0   ;;  %vm588_vm3 = vcmask 57344   ;;  %vm582_vm4 = vcmask 58368   ;;  %s2339_s12 = smov 8   ;;  %s2340_s13 = smov 16  }
  0x15   : > { %399 = vmatpush.bf16.msra.mxu0 %v390_v1  ;;  %2219 = vmatpush.bf16.msra.mxu3 %v390_v1  ;;  %s219_s7 = scalar_select %p218_p10, %s2399_s22, 1  ;;  %580 = vst.msk [vmem:[#allocation2] sm:$0xff] %vm579_vm2, %v2338_v11  ;;  %vm894_vm5 = vsmask.f32 7424  ;;  %vm1119_vm6 = vcmask 1046528   ;;  %vm1772_vm7 = vcmask 1043456  }
  0x16   : > { %581 = vst.msk [vmem:[#allocation2 + $0x8] sm:$0xff] %vm579_vm2, %v2338_v11  ;;  %v224_v36 = vld [vmem:[%s3623_s2] sm:$0x7]  ;;  %s2341_s16 = smov 24   ;;  %s2342_s17 = smov 40   ;;  %vm1470_vm8 = vcmask 130048  }
  0x17   : > { %s2197_s8 = sshll.u32 %s219_s7, 7  ;;  %583 = vst.msk [vmem:[#allocation2 + $0x10] sm:$0x3] %vm582_vm4, %v2338_v11  ;;  %v2554_v37 = vperm.slane %v224_v36, 0  ;;  %v2557_v40 = vperm.slane %v224_v36, 1  ;;  %v2560_v43 = vperm.slane %v224_v36, 2 }
  0x18   : > { %s2434_s11 = scalar_lea.vmem %s3621_s0, %s2197_s8  ;;  %589 = vst.msk [vmem:[#allocation2] sm:$0x1] %vm588_vm3, %v2338_v11  ;;  %s2343_s23 = smov 64   ;;  %vm1503_vm9 = vcmask 195584   ;;  %vm1536_vm10 = vcmask 261120   ;;  %vm1569_vm11 = vcmask 326656  }
  0x19   : > { %v2198_v2 = vld [vmem:[%s2434_s11] sm:$0xff]  ;;  %v2207_v3 = vld [vmem:[%s2434_s11 + $0x48] sm:$0xff]  ;;  %v2208_v5 = vld [vmem:[%s2434_s11 + $0x50] sm:$0xff]  ;;  %607 = vst.msk [vmem:[#allocation2 + $0x11] sm:$0x1] %vm588_vm3, %v2338_v11  ;;  %s2344_s25 = smov 32  }
  0x1a   : > { %2144 = vmatmul.msk.bf16.vlgmr.msra.gmra.mxu0 %vm339_vm1, %v2198_v2  ;;  %2153 = vmatmul.msk.bf16.vlgmr.msra.gmra.mxu3 %vm339_vm1, %v2207_v3  ;;  %v2199_v4 = vld [vmem:[%s2434_s11 + $0x8] sm:$0xff]  ;;  %v2200_v6 = vld [vmem:[%s2434_s11 + $0x10] sm:$0xff]  ;;  %v2209_v7 = vld [vmem:[%s2434_s11 + $0x58] sm:$0xff]  ;;  %585 = vst.msk [vmem:[#allocation2 + $0x198] sm:$0xff] %vm579_vm2, %v2338_v11  ;;  %s2345_s26 = smov 48   ;;  %s2346_s30 = smov 56  }
  0x1b   : > { %v2201_v8 = vld [vmem:[%s2434_s11 + $0x18] sm:$0xff]  ;;  %v2210_v9 = vld [vmem:[%s2434_s11 + $0x60] sm:$0xff]  ;;  %586 = vst.msk [vmem:[#allocation2 + $0x1a0] sm:$0xff] %vm579_vm2, %v2338_v11  ;;  %v2203_v33 = vld [vmem:[%s2434_s11 + $0x28] sm:$0xff]  ;;  %vm1602_vm12 = vcmask 392192   ;;  %vm1635_vm13 = vcmask 457728  }
  0x1c   : > { %v2202_v10 = vld [vmem:[%s2434_s11 + $0x20] sm:$0xff]  ;;  %587 = vst.msk [vmem:[#allocation2 + $0x1a8] sm:$0x3] %vm582_vm4, %v2338_v11  ;;  %v2211_v34 = vld [vmem:[%s2434_s11 + $0x68] sm:$0xff]  ;;  %v2204_v35 = vld [vmem:[%s2434_s11 + $0x30] sm:$0xff]  ;;  %vm1668_vm14 = vcmask 523264  }
  0x1d   : > { %v659_v12 = vld [vmem:[#allocation2 + $0x8] sm:$0xff]  ;;  %590 = vst.msk [vmem:[#allocation2 + $0x18] sm:$0x1] %vm588_vm3, %v2338_v11  ;;  %v2212_v41 = vld [vmem:[%s2434_s11 + $0x70] sm:$0xff]  ;;  %v2205_v48 = vld [vmem:[%s2434_s11 + $0x38] sm:$0xff]  ;;  %vm1739_vm15 = vcmask 588800  }
  0x1e   : > { %v713_v13 = vpack.c.bf16 %v659_v12, %v659_v12  ;;  %591 = vst.msk [vmem:[#allocation2 + $0x30] sm:$0x1] %vm588_vm3, %v2338_v11  ;;  %s215_s10 = sand.u32 1, %s2328_s19   ;;  %s2294_s8 = scalar_lea.hbm %s3626_s5, 512 }
  0x1f   : > { %v658_v14 = vld [vmem:[#allocation2] sm:$0xff]  ;;  %592 = vst.msk [vmem:[#allocation2 + $0x48] sm:$0x1] %vm588_vm3, %v2338_v11 }
  0x20   : > { %v660_v15 = vld [vmem:[#allocation2 + $0x10] sm:$0x3]  ;;  %v712_v16 = vpack.c.bf16 %v658_v14, %v658_v14  ;;  %v799_v17 = vunpack.c.l.b16 %v713_v13  ;;  %593 = vst.msk [vmem:[#allocation2 + $0x60] sm:$0x1] %vm588_vm3, %v2338_v11 }
  0x21   : > { %v744_v18 = vpack.c.bf16 %v660_v15, %v660_v15  ;;  %594 = vst.msk [vmem:[#allocation2 + $0x78] sm:$0x1] %vm588_vm3, %v2338_v11 }
  0x22   : > { %v798_v19 = vunpack.c.l.b16 %v712_v16  ;;  %595 = vst.msk [vmem:[#allocation2 + $0x90] sm:$0x1] %vm588_vm3, %v2338_v11 }
  0x23   : > { %v862_v20 = vunpack.c.l.b16 %v744_v18  ;;  %596 = vst.msk [vmem:[#allocation2 + $0xa8] sm:$0x1] %vm588_vm3, %v2338_v11 }
  0x24   : > { %v2482_v21 = vpack.c.b16 %v799_v17, %v798_v19  ;;  %597 = vst.msk [vmem:[#allocation2 + $0xc0] sm:$0x1] %vm588_vm3, %v2338_v11 }
  0x25   : > { %v878_v22 = vpack.c.b16 %v862_v20, %v862_v20  ;;  %598 = vst.msk [vmem:[#allocation2 + $0xd8] sm:$0x1] %vm588_vm3, %v2338_v11 }
  0x26   : > { %v896_v23 = vshrl.u32 %v2482_v21, 16  ;;  %v898_v24 = vshll.u32 %v2482_v21, 16  ;;  %599 = vst.msk [vmem:[#allocation2 + $0xf0] sm:$0x1] %vm588_vm3, %v2338_v11  ;;  %v1120_v29 = vrot.slane %v2482_v21, 1 }
  0x27   : > { %v903_v25 = vshll.u32 %v878_v22, 16  ;;  %600 = vst.msk [vmem:[#allocation2 + $0x108] sm:$0x1] %vm588_vm3, %v2338_v11  ;;  %v1121_v30 = vrot.slane %v878_v22, 1 }
  0x28   : > { %v900_v26 = vrot.slane %v898_v24, 1  ;;  %601 = vst.msk [vmem:[#allocation2 + $0x120] sm:$0x1] %vm588_vm3, %v2338_v11 }
  0x29   : > { %v905_v27 = vrot.slane %v903_v25, 1  ;;  %602 = vst.msk [vmem:[#allocation2 + $0x138] sm:$0x1] %vm588_vm3, %v2338_v11  ;;  %v1122_v32 = vsel %vm1119_vm6, %v1120_v29, %v1121_v30 }
  0x2a   : > { %2145 = vmatmul.msk.bf16.gmra.mxu0 %vm339_vm1, %v2199_v4  ;;  %2154 = vmatmul.msk.bf16.gmra.mxu3 %vm339_vm1, %v2208_v5  ;;  %v901_v28 = vor.u32 %v900_v26, %v896_v23  ;;  %603 = vst.msk [vmem:[#allocation2 + $0x150] sm:$0x1] %vm588_vm3, %v2338_v11 }
  0x2b   : > { %604 = vst.msk [vmem:[#allocation2 + $0x168] sm:$0x1] %vm588_vm3, %v2338_v11  ;;  %1168 = vrot.lane.b32.xlu1 %v1122_v32, %s2340_s13 }
  0x2c   : > { %v906_v31 = vsel %vm894_vm5, %v901_v28, %v905_v27  ;;  %605 = vst.msk [vmem:[#allocation2 + $0x180] sm:$0x1] %vm588_vm3, %v2338_v11 }
  0x2d   : > { %1087 = vrot.lane.b32.xlu0 %v906_v31, %s2339_s12  ;;  %608 = vst.msk [vmem:[#allocation2 + $0x29] sm:$0x1] %vm588_vm3, %v2338_v11 }
  0x2e   : > { %609 = vst.msk [vmem:[#allocation2 + $0x41] sm:$0x1] %vm588_vm3, %v2338_v11 }
  0x2f   : > { %610 = vst.msk [vmem:[#allocation2 + $0x59] sm:$0x1] %vm588_vm3, %v2338_v11 }
  0x30   : > { %611 = vst.msk [vmem:[#allocation2 + $0x71] sm:$0x1] %vm588_vm3, %v2338_v11 }
  0x31   : > { %612 = vst.msk [vmem:[#allocation2 + $0x89] sm:$0x1] %vm588_vm3, %v2338_v11 }
  0x32   : > { %613 = vst.msk [vmem:[#allocation2 + $0xa1] sm:$0x1] %vm588_vm3, %v2338_v11 }
  0x33   : > { %614 = vst.msk [vmem:[#allocation2 + $0xb9] sm:$0x1] %vm588_vm3, %v2338_v11 }
  0x34   : > { %615 = vst.msk [vmem:[#allocation2 + $0xd1] sm:$0x1] %vm588_vm3, %v2338_v11 }
  0x35   : > { %616 = vst.msk [vmem:[#allocation2 + $0xe9] sm:$0x1] %vm588_vm3, %v2338_v11 }
  0x36   : > { %617 = vst.msk [vmem:[#allocation2 + $0x101] sm:$0x1] %vm588_vm3, %v2338_v11 }
  0x37   : > { %618 = vst.msk [vmem:[#allocation2 + $0x119] sm:$0x1] %vm588_vm3, %v2338_v11 }
  0x38   : > { %619 = vst.msk [vmem:[#allocation2 + $0x131] sm:$0x1] %vm588_vm3, %v2338_v11 }
  0x39   : > { %620 = vst.msk [vmem:[#allocation2 + $0x149] sm:$0x1] %vm588_vm3, %v2338_v11 }
  0x3a   : > { %2146 = vmatmul.msk.bf16.gmra.mxu0 %vm339_vm1, %v2200_v6  ;;  %2155 = vmatmul.msk.bf16.gmra.mxu3 %vm339_vm1, %v2209_v7  ;;  %621 = vst.msk [vmem:[#allocation2 + $0x161] sm:$0x1] %vm588_vm3, %v2338_v11 }
  0x3b   : > { %622 = vst.msk [vmem:[#allocation2 + $0x179] sm:$0x1] %vm588_vm3, %v2338_v11 }
  0x3c   : > { %623 = vst.msk [vmem:[#allocation2 + $0x191] sm:$0x1] %vm588_vm3, %v2338_v11 }
  0x3d   : > { %606 = vst.msk [vmem:[#allocation2 + $0x198] sm:$0x1] %vm588_vm3, %v2338_v11 }
  0x3e   : > { %624 = vst.msk [vmem:[#allocation2 + $0x1a9] sm:$0x1] %vm588_vm3, %v2338_v11 }
  0x4a   : > { %2147 = vmatmul.msk.bf16.gmra.mxu0 %vm339_vm1, %v2201_v8  ;;  %2156 = vmatmul.msk.bf16.gmra.mxu3 %vm339_vm1, %v2210_v9  ;;  %v2206_v8 = vld [vmem:[%s2434_s11 + $0x40] sm:$0xff] }
  0x5a   : > { %2148 = vmatmul.msk.bf16.gmra.mxu0 %vm339_vm1, %v2202_v10  ;;  %2157 = vmatmul.msk.bf16.gmra.mxu3 %vm339_vm1, %v2211_v34 }
  0x6a   : > { %2149 = vmatmul.msk.bf16.gmra.mxu0 %vm339_vm1, %v2203_v33  ;;  %2158 = vmatmul.msk.bf16.gmra.mxu3 %vm339_vm1, %v2212_v41 }
  0x7a   : > { %2150 = vmatmul.msk.bf16.gmra.mxu0 %vm339_vm1, %v2204_v35 }
  0x8a   : > { %2151 = vmatmul.msk.bf16.gmra.mxu0 %vm339_vm1, %v2205_v48 }
  0x97   : > { %v401_v38 = vpop.f32.mrf.mxu0 }
  0x98   : > { %v402_v39 = vadd.f32 %v401_v38, %v2554_v37 }
  0x9a   : > { %v481_v42 = vmax.f32 %v402_v39, 0.0  ;;  %2152 = vmatmul.msk.bf16.gmra.mxu0 %vm339_vm1, %v2206_v8 }
  0x9c   : > { %v514_v44 = vmul.f32 %v2557_v40, %v481_v42 }
  0x9d   : > { %v446_v45 = vpop.f32.mrf.mxu3 }
  0x9e   : > { %v547_v46 = vadd.f32 %v2560_v43, %v514_v44  ;;  %v447_v47 = vadd.f32 %v446_v45, %v2554_v37 }
  0x9f   : > { %v403_v49 = vpop.f32.mrf.mxu0 }
  0xa0   : > { %626 = vst.msk [vmem:[#allocation2 + $0x19] sm:$0xff] %vm579_vm2, %v547_v46  ;;  %v499_v50 = vmax.f32 %v447_v47, 0.0  ;;  %v404_v51 = vadd.f32 %v403_v49, %v2554_v37 }
  0xa2   : > { %v532_v52 = vmul.f32 %v2557_v40, %v499_v50  ;;  %v482_v53 = vmax.f32 %v404_v51, 0.0 }
  0xa4   : > { %v565_v54 = vadd.f32 %v2560_v43, %v532_v52  ;;  %v515_v55 = vmul.f32 %v2557_v40, %v482_v53 }
  0xa5   : > { %v448_v56 = vpop.f32.mrf.mxu3 }
  0xa6   : > { %644 = vst.msk [vmem:[#allocation2 + $0xf1] sm:$0xff] %vm579_vm2, %v565_v54  ;;  %v548_v57 = vadd.f32 %v2560_v43, %v515_v55  ;;  %v449_v58 = vadd.f32 %v448_v56, %v2554_v37 }
  0xa7   : > { %v406_v59 = vpop.f32.mrf.mxu0  ;;  %v661_v0 = vld [vmem:[#allocation2 + $0x18] sm:$0xff] }
  0xa8   : > { %627 = vst.msk [vmem:[#allocation2 + $0x21] sm:$0xff] %vm579_vm2, %v548_v57  ;;  %v500_v60 = vmax.f32 %v449_v58, 0.0  ;;  %v407_v61 = vadd.f32 %v406_v59, %v2554_v37  ;;  %v714_v3 = vpack.c.bf16 %v661_v0, %v661_v0 }
  0xaa   : > { %v533_v62 = vmul.f32 %v2557_v40, %v500_v60  ;;  %v483_v63 = vmax.f32 %v407_v61, 0.0  ;;  %v800_v16 = vunpack.c.l.b16 %v714_v3 }
  0xac   : > { %v566_v1 = vadd.f32 %v2560_v43, %v533_v62  ;;  %v516_v2 = vmul.f32 %v2557_v40, %v483_v63 }
  0xad   : > { %v451_v4 = vpop.f32.mrf.mxu3  ;;  %v688_v7 = vld [vmem:[#allocation2 + $0xf0] sm:$0xff] }
  0xae   : > { %645 = vst.msk [vmem:[#allocation2 + $0xf9] sm:$0xff] %vm579_vm2, %v566_v1  ;;  %v549_v5 = vadd.f32 %v2560_v43, %v516_v2  ;;  %v452_v6 = vadd.f32 %v451_v4, %v2554_v37  ;;  %v732_v17 = vpack.c.bf16 %v688_v7, %v688_v7 }
  0xaf   : > { %v662_v9 = vld [vmem:[#allocation2 + $0x20] sm:$0xff]  ;;  %v408_v10 = vpop.f32.mrf.mxu0  ;;  %v663_v11 = vld [vmem:[#allocation2 + $0x28] sm:$0x3] }
  0xb0   : > { %628 = vst.msk [vmem:[#allocation2 + $0x31] sm:$0xff] %vm579_vm2, %v549_v5  ;;  %v715_v12 = vpack.c.bf16 %v662_v9, %v662_v9  ;;  %v409_v13 = vadd.f32 %v408_v10, %v2554_v37  ;;  %v745_v14 = vpack.c.bf16 %v663_v11, %v663_v11  ;;  %v501_v15 = vmax.f32 %v452_v6, 0.0 }
  0xb1   : > { %v818_v33 = vunpack.c.l.b16 %v732_v17 }
  0xb2   : > { %v801_v18 = vunpack.c.l.b16 %v715_v12  ;;  %v484_v19 = vmax.f32 %v409_v13, 0.0  ;;  %v863_v20 = vunpack.c.l.b16 %v745_v14  ;;  %v534_v22 = vmul.f32 %v2557_v40, %v501_v15 }
  0xb4   : > { %v2589_v23 = vpack.c.b16 %v801_v18, %v800_v16  ;;  %v517_v24 = vmul.f32 %v2557_v40, %v484_v19  ;;  %v879_v25 = vpack.c.b16 %v863_v20, %v863_v20  ;;  %v567_v26 = vadd.f32 %v2560_v43, %v534_v22 }
  0xb5   : > { %v689_v27 = vld [vmem:[#allocation2 + $0xf8] sm:$0xff]  ;;  %v690_v28 = vld [vmem:[#allocation2 + $0x100] sm:$0x3]  ;;  %v453_v29 = vpop.f32.mrf.mxu3 }
  0xb6   : > { %1205 = vrot.lane.b32.xlu2 %v2589_v23, %s2341_s16  ;;  %v550_v30 = vadd.f32 %v2560_v43, %v517_v24  ;;  %v1123_v31 = vrot.slane %v2589_v23, 1  ;;  %v1124_v32 = vrot.slane %v879_v25, 1  ;;  %646 = vst.msk [vmem:[#allocation2 + $0x109] sm:$0xff] %vm579_vm2, %v567_v26  ;;  %v910_v34 = vshll.u32 %v2589_v23, 16 }
  0xb7   : > { %v915_v35 = vshll.u32 %v879_v25, 16  ;;  %v733_v36 = vpack.c.bf16 %v689_v27, %v689_v27  ;;  %v754_v38 = vpack.c.bf16 %v690_v28, %v690_v28  ;;  %v454_v41 = vadd.f32 %v453_v29, %v2554_v37  ;;  %v411_v47 = vpop.f32.mrf.mxu0  ;;  %v664_v8 = vld [vmem:[#allocation2 + $0x30] sm:$0xff] }
  0xb8   : > { %629 = vst.msk [vmem:[#allocation2 + $0x39] sm:$0xff] %vm579_vm2, %v550_v30  ;;  %v1125_v39 = vsel %vm1119_vm6, %v1123_v31, %v1124_v32  ;;  %v908_v42 = vshrl.u32 %v2589_v23, 16  ;;  %v912_v44 = vrot.slane %v910_v34, 1  ;;  %v412_v49 = vadd.f32 %v411_v47, %v2554_v37 }
  0xb9   : > { %1287 = vrot.lane.b32.xlu1 %v1125_v39, %s2342_s17  ;;  %v819_v45 = vunpack.c.l.b16 %v733_v36  ;;  %v872_v46 = vunpack.c.l.b16 %v754_v38  ;;  %v502_v48 = vmax.f32 %v454_v41, 0.0  ;;  %v917_v51 = vrot.slane %v915_v35, 1 }
  0xba   : > { %v913_v50 = vor.u32 %v912_v44, %v908_v42  ;;  %v485_v55 = vmax.f32 %v412_v49, 0.0  ;;  %v716_v14 = vpack.c.bf16 %v664_v8, %v664_v8 }
  0xbb   : > { %v2605_v52 = vpack.c.b16 %v819_v45, %v818_v33  ;;  %v888_v53 = vpack.c.b16 %v872_v46, %v872_v46  ;;  %v535_v54 = vmul.f32 %v2557_v40, %v502_v48 }
  0xbc   : > { %v918_v56 = vsel %vm894_vm5, %v913_v50, %v917_v51  ;;  %v518_v60 = vmul.f32 %v2557_v40, %v485_v55  ;;  %v802_v22 = vunpack.c.l.b16 %v716_v14 }
  0xbd   : > { %v1150_v57 = vrot.slane %v2605_v52, 1  ;;  %v1151_v58 = vrot.slane %v888_v53, 1  ;;  %1089 = vrot.lane.b32.xlu0 %v918_v56, %s2339_s12  ;;  %v568_v59 = vadd.f32 %v2560_v43, %v535_v54  ;;  %v1018_v62 = vshll.u32 %v2605_v52, 16  ;;  %v456_v13 = vpop.f32.mrf.mxu3  ;;  %v691_v36 = vld [vmem:[#allocation2 + $0x108] sm:$0xff] }
  0xbe   : > { %1170 = vrot.lane.b32.xlu2 %v1125_v39, %s2340_s13  ;;  %v551_v63 = vadd.f32 %v2560_v43, %v518_v60  ;;  %v1016_v6 = vshrl.u32 %v2605_v52, 16  ;;  %v1023_v7 = vshll.u32 %v888_v53, 16  ;;  %v457_v16 = vadd.f32 %v456_v13, %v2554_v37 }
  0xbf   : > { %v1152_v61 = vsel %vm1119_vm6, %v1150_v57, %v1151_v58  ;;  %647 = vst.msk [vmem:[#allocation2 + $0x111] sm:$0xff] %vm579_vm2, %v568_v59  ;;  %v413_v0 = vpop.f32.mrf.mxu0  ;;  %v1020_v3 = vrot.slane %v1018_v62, 1  ;;  %v666_v4 = vld [vmem:[#allocation2 + $0x40] sm:$0x3]  ;;  %v665_v9 = vld [vmem:[#allocation2 + $0x38] sm:$0xff]  ;;  %v734_v44 = vpack.c.bf16 %v691_v36, %v691_v36 }
  0xc0   : > { %v414_v1 = vadd.f32 %v413_v0, %v2554_v37  ;;  %630 = vst.msk [vmem:[#allocation2 + $0x49] sm:$0xff] %vm579_vm2, %v551_v63  ;;  %v746_v10 = vpack.c.bf16 %v666_v4, %v666_v4  ;;  %v717_v15 = vpack.c.bf16 %v665_v9, %v665_v9  ;;  %v1025_v17 = vrot.slane %v1023_v7, 1 }
  0xc1   : > { %1422 = vrot.lane.b32.xlu1 %v1152_v61, %s2343_s23  ;;  %v1021_v12 = vor.u32 %v1020_v3, %v1016_v6  ;;  %v503_v19 = vmax.f32 %v457_v16, 0.0  ;;  %v820_v50 = vunpack.c.l.b16 %v734_v44 }
  0xc2   : > { %v486_v2 = vmax.f32 %v414_v1, 0.0  ;;  %v864_v18 = vunpack.c.l.b16 %v746_v10  ;;  %v803_v24 = vunpack.c.l.b16 %v717_v15 }
  0xc3   : > { %v1026_v20 = vsel %vm894_vm5, %v1021_v12, %v1025_v17  ;;  %v536_v25 = vmul.f32 %v2557_v40, %v503_v19 }
  0xc4   : > { %v519_v5 = vmul.f32 %v2557_v40, %v486_v2  ;;  %v880_v26 = vpack.c.b16 %v864_v18, %v864_v18  ;;  %v2637_v29 = vpack.c.b16 %v803_v24, %v802_v22 }
  0xc5   : > { %1252 = vrot.lane.b32.xlu0 %v918_v56, %s2344_s25  ;;  %v569_v27 = vadd.f32 %v2560_v43, %v536_v25  ;;  %v458_v28 = vpop.f32.mrf.mxu3 }
  0xc6   : > { %1340 = vrot.lane.b32.xlu2 %v2605_v52, %s2345_s26  ;;  %v552_v11 = vadd.f32 %v2560_v43, %v519_v5  ;;  %v459_v30 = vadd.f32 %v458_v28, %v2554_v37  ;;  %v1126_v31 = vrot.slane %v2637_v29, 1  ;;  %v1127_v32 = vrot.slane %v880_v26, 1  ;;  %v692_v39 = vld [vmem:[#allocation2 + $0x110] sm:$0xff]  ;;  %v693_v48 = vld [vmem:[#allocation2 + $0x118] sm:$0x3] }
  0xc7   : > { %648 = vst.msk [vmem:[#allocation2 + $0x121] sm:$0xff] %vm579_vm2, %v569_v27  ;;  %v416_v41 = vpop.f32.mrf.mxu0  ;;  %v735_v45 = vpack.c.bf16 %v692_v39, %v692_v39  ;;  %v922_v46 = vshll.u32 %v2637_v29, 16  ;;  %v920_v51 = vshrl.u32 %v2637_v29, 16  ;;  %v927_v53 = vshll.u32 %v880_v26, 16  ;;  %v667_v15 = vld [vmem:[#allocation2 + $0x48] sm:$0xff] }
  0xc8   : > { %631 = vst.msk [vmem:[#allocation2 + $0x51] sm:$0xff] %vm579_vm2, %v552_v11  ;;  %v504_v33 = vmax.f32 %v459_v30, 0.0  ;;  %v1128_v35 = vsel %vm1119_vm6, %v1126_v31, %v1127_v32  ;;  %v417_v42 = vadd.f32 %v416_v41, %v2554_v37  ;;  %v755_v56 = vpack.c.bf16 %v693_v48, %v693_v48 }
  0xc9   : > { %1305 = vrot.lane.b32.xlu1 %v1152_v61, %s2342_s17  ;;  %v821_v54 = vunpack.c.l.b16 %v735_v45  ;;  %v924_v55 = vrot.slane %v922_v46, 1  ;;  %v929_v60 = vrot.slane %v927_v53, 1  ;;  %v718_v24 = vpack.c.bf16 %v667_v15, %v667_v15 }
  0xca   : > { %v537_v34 = vmul.f32 %v2557_v40, %v504_v33  ;;  %v487_v47 = vmax.f32 %v417_v42, 0.0  ;;  %v873_v63 = vunpack.c.l.b16 %v755_v56 }
  0xcb   : > { %v925_v62 = vor.u32 %v924_v55, %v920_v51  ;;  %v804_v32 = vunpack.c.l.b16 %v718_v24 }
  0xcc   : > { %v570_v38 = vadd.f32 %v2560_v43, %v537_v34  ;;  %v520_v49 = vmul.f32 %v2557_v40, %v487_v47  ;;  %v889_v3 = vpack.c.b16 %v873_v63, %v873_v63 }
  0xcd   : > { %1387 = vrot.lane.b32.xlu0 %v1026_v20, %s2346_s30  ;;  %v930_v2 = vsel %vm894_vm5, %v925_v62, %v929_v60 }
  0xce   : > { %1223 = vrot.lane.b32.xlu2 %v2605_v52, %s2341_s16  ;;  %649 = vst.msk [vmem:[#allocation2 + $0x129] sm:$0xff] %vm579_vm2, %v570_v38  ;;  %v553_v57 = vadd.f32 %v2560_v43, %v520_v49  ;;  %v1154_v8 = vrot.slane %v889_v3, 1  ;;  %v1035_v14 = vshll.u32 %v889_v3, 16 }
  0xcf   : > { %v418_v58 = vpop.f32.mrf.mxu0  ;;  %v669_v11 = vld [vmem:[#allocation2 + $0x58] sm:$0x3]  ;;  %v668_v16 = vld [vmem:[#allocation2 + $0x50] sm:$0xff] }
  0xd0   : > { %632 = vst.msk [vmem:[#allocation2 + $0x61] sm:$0xff] %vm579_vm2, %v553_v57  ;;  %v419_v59 = vadd.f32 %v418_v58, %v2554_v37  ;;  %v747_v19 = vpack.c.bf16 %v669_v11, %v669_v11  ;;  %v719_v25 = vpack.c.bf16 %v668_v16, %v668_v16  ;;  %v1037_v28 = vrot.slane %v1035_v14, 1  ;;  %v2213_v57 = vld [vmem:[%s2434_s11 + $0x78] sm:$0xff]  ;;  %v694_v58 = vld [vmem:[#allocation2 + $0x120] sm:$0xff]  ;;  %s2077_s11 = sshll.u32 %s215_s10, 8 }
  0xd1   : > { %1107 = vrot.lane.b32.xlu1 %v1026_v20, %s2339_s12  ;;  %2159 = vmatmul.msk.bf16.gmra.mxu3 %vm339_vm1, %v2213_v57 }
  0xd2   : > { %v488_v0 = vmax.f32 %v419_v59, 0.0  ;;  %v865_v30 = vunpack.c.l.b16 %v747_v19  ;;  %v805_v33 = vunpack.c.l.b16 %v719_v25 }
  0xd4   : > { %v521_v1 = vmul.f32 %v2557_v40, %v488_v0  ;;  %v2689_v39 = vpack.c.b16 %v865_v30, %v865_v30  ;;  %v2693_v44 = vpack.c.b16 %v805_v33, %v804_v32 }
  0xd5   : > { %1270 = vrot.lane.b32.xlu0 %v1026_v20, %s2344_s25  ;;  %v695_v59 = vld [vmem:[#allocation2 + $0x128] sm:$0xff]  ;;  %v696_v60 = vld [vmem:[#allocation2 + $0x130] sm:$0x3] }
  0xd6   : > { %1188 = vrot.lane.b32.xlu2 %v1152_v61, %s2340_s13  ;;  %v2660_v61 = vpack.c.b16 %v821_v54, %v820_v50  ;;  %v554_v4 = vadd.f32 %v2560_v43, %v521_v1  ;;  %v1129_v46 = vrot.slane %v2693_v44, 1  ;;  %v1130_v47 = vrot.slane %v2689_v39, 1 }
  0xd7   : > { %v421_v5 = vpop.f32.mrf.mxu0  ;;  %v736_v1 = vpack.c.bf16 %v694_v58, %v694_v58  ;;  %v756_v3 = vpack.c.bf16 %v696_v60, %v696_v60  ;;  %v939_v25 = vshll.u32 %v2689_v39, 16  ;;  %v670_v39 = vld [vmem:[#allocation2 + $0x60] sm:$0xff] }
  0xd8   : > { %633 = vst.msk [vmem:[#allocation2 + $0x69] sm:$0xff] %vm579_vm2, %v554_v4  ;;  %v422_v6 = vadd.f32 %v421_v5, %v2554_v37  ;;  %v1153_v7 = vrot.slane %v2660_v61, 1  ;;  %v1030_v9 = vshll.u32 %v2660_v61, 16  ;;  %v1028_v13 = vshrl.u32 %v2660_v61, 16 }
  0xd9   : > { %1406 = vrot.lane.b32.xlu1 %v1128_v35, %s2343_s23  ;;  %v1131_v54 = vsel %vm1119_vm6, %v1129_v46, %v1130_v47 }
  0xda   : > { %v489_v10 = vmax.f32 %v422_v6, 0.0  ;;  %v1155_v17 = vsel %vm1119_vm6, %v1153_v7, %v1154_v8  ;;  %v1032_v18 = vrot.slane %v1030_v9, 1  ;;  %v822_v8 = vunpack.c.l.b16 %v736_v1 }
  0xdc   : > { %v522_v12 = vmul.f32 %v2557_v40, %v489_v10  ;;  %v1033_v27 = vor.u32 %v1032_v18, %v1028_v13  ;;  %v874_v10 = vunpack.c.l.b16 %v756_v3 }
  0xdd   : > { %1172 = vrot.lane.b32.xlu0 %v1128_v35, %s2340_s13 }
  0xde   : > { %1324 = vrot.lane.b32.xlu2 %v2637_v29, %s2345_s26  ;;  %v555_v20 = vadd.f32 %v2560_v43, %v522_v12  ;;  %v1038_v38 = vsel %vm894_vm5, %v1033_v27, %v1037_v28  ;;  %v934_v12 = vshll.u32 %v2693_v44, 16  ;;  %v890_v15 = vpack.c.b16 %v874_v10, %v874_v10 }
  0xdf   : > { %v423_v22 = vpop.f32.mrf.mxu0  ;;  %v672_v32 = vld [vmem:[#allocation2 + $0x70] sm:$0x3] }
  0xe0   : > { %634 = vst.msk [vmem:[#allocation2 + $0x79] sm:$0xff] %vm579_vm2, %v555_v20  ;;  %v424_v26 = vadd.f32 %v423_v22, %v2554_v37  ;;  %v932_v20 = vshrl.u32 %v2693_v44, 16  ;;  %v936_v22 = vrot.slane %v934_v12, 1  ;;  %v1157_v30 = vrot.slane %v890_v15, 1 }
  0xe1   : > { %1289 = vrot.lane.b32.xlu1 %v1128_v35, %s2342_s17  ;;  %v461_v35 = vpop.f32.mrf.mxu3 }
  0xe2   : > { %v490_v31 = vmax.f32 %v424_v26, 0.0  ;;  %v462_v36 = vadd.f32 %v461_v35, %v2554_v37  ;;  %v937_v35 = vor.u32 %v936_v22, %v932_v20 }
  0xe4   : > { %v523_v34 = vmul.f32 %v2557_v40, %v490_v31  ;;  %v505_v42 = vmax.f32 %v462_v36, 0.0  ;;  %v941_v36 = vrot.slane %v939_v25, 1  ;;  %v2784_v25 = vpop.permute.xlu1 %1168 }
  0xe5   : > { %1225 = vrot.lane.b32.xlu0 %v2660_v61, %s2341_s16 }
  0xe6   : > { %1207 = vrot.lane.b32.xlu2 %v2637_v29, %s2341_s16  ;;  %v556_v41 = vadd.f32 %v2560_v43, %v523_v34  ;;  %v538_v45 = vmul.f32 %v2557_v40, %v505_v42  ;;  %v942_v58 = vsel %vm894_vm5, %v937_v35, %v941_v36  ;;  %v2799_v36 = vpop.permute.xlu0 %1087 }
  0xe7   : > { %v426_v49 = vpop.f32.mrf.mxu0 }
  0xe8   : > { %635 = vst.msk [vmem:[#allocation2 + $0x81] sm:$0xff] %vm579_vm2, %v556_v41  ;;  %v571_v48 = vadd.f32 %v2560_v43, %v538_v45  ;;  %v427_v50 = vadd.f32 %v426_v49, %v2554_v37  ;;  %v671_v41 = vld [vmem:[#allocation2 + $0x68] sm:$0xff]  ;;  %v748_v49 = vpack.c.bf16 %v672_v32, %v672_v32 }
  0xe9   : > { %1091 = vrot.lane.b32.xlu1 %v930_v2, %s2339_s12  ;;  %v463_v51 = vpop.f32.mrf.mxu3 }
  0xea   : > { %650 = vst.msk [vmem:[#allocation2 + $0x139] sm:$0xff] %vm579_vm2, %v571_v48  ;;  %v464_v53 = vadd.f32 %v463_v51, %v2554_v37  ;;  %v491_v55 = vmax.f32 %v427_v50, 0.0  ;;  %v1047_v48 = vshll.u32 %v890_v15, 16 }
  0xec   : > { %v506_v56 = vmax.f32 %v464_v53, 0.0  ;;  %v524_v62 = vmul.f32 %v2557_v40, %v491_v55  ;;  %v720_v55 = vpack.c.bf16 %v670_v39, %v670_v39 }
  0xed   : > { %1371 = vrot.lane.b32.xlu0 %v930_v2, %s2346_s30 }
  0xee   : > { %1342 = vrot.lane.b32.xlu2 %v2660_v61, %s2345_s26  ;;  %v539_v63 = vmul.f32 %v2557_v40, %v506_v56  ;;  %v557_v0 = vadd.f32 %v2560_v43, %v524_v62  ;;  %v721_v56 = vpack.c.bf16 %v671_v41, %v671_v41  ;;  %v806_v3 = vunpack.c.l.b16 %v720_v55 }
  0xef   : > { %v428_v5 = vpop.f32.mrf.mxu0 }
  0xf0   : > { %v572_v4 = vadd.f32 %v2560_v43, %v539_v63  ;;  %636 = vst.msk [vmem:[#allocation2 + $0x91] sm:$0xff] %vm579_vm2, %v557_v0  ;;  %v429_v6 = vadd.f32 %v428_v5, %v2554_v37  ;;  %v1049_v63 = vrot.slane %v1047_v48, 1  ;;  %v866_v0 = vunpack.c.l.b16 %v748_v49 }
  0xf1   : > { %1424 = vrot.lane.b32.xlu1 %v1155_v17, %s2343_s23  ;;  %v697_v32 = vld [vmem:[#allocation2 + $0x138] sm:$0xff] }
  0xf2   : > { %651 = vst.msk [vmem:[#allocation2 + $0x141] sm:$0xff] %vm579_vm2, %v572_v4  ;;  %v492_v7 = vmax.f32 %v429_v6, 0.0  ;;  %v807_v4 = vunpack.c.l.b16 %v721_v56 }
  0xf4   : > { %v525_v11 = vmul.f32 %v2557_v40, %v492_v7 }
  0xf5   : > { %1254 = vrot.lane.b32.xlu0 %v930_v2, %s2344_s25  ;;  %v737_v2 = vpack.c.bf16 %v695_v59, %v695_v59 }
  0xf6   : > { %1307 = vrot.lane.b32.xlu2 %v1155_v17, %s2342_s17  ;;  %v558_v13 = vadd.f32 %v2560_v43, %v525_v11 }
  0xf7   : > { %v823_v9 = vunpack.c.l.b16 %v737_v2  ;;  %v431_v16 = vpop.f32.mrf.mxu0 }
  0xf8   : > { %637 = vst.msk [vmem:[#allocation2 + $0x99] sm:$0xff] %vm579_vm2, %v558_v13  ;;  %v432_v18 = vadd.f32 %v431_v16, %v2554_v37  ;;  %v2774_v13 = vpack.c.b16 %v807_v4, %v806_v3  ;;  %v2217_v3 = vld [vmem:[%s3624_s3 + $0x18] sm:$0xff] }
  0xf9   : > { %1272 = vrot.lane.b32.xlu1 %v1038_v38, %s2344_s25  ;;  %v2723_v14 = vpack.c.b16 %v823_v9, %v822_v8  ;;  %v2766_v8 = vpack.c.b16 %v866_v0, %v866_v0  ;;  %v698_v35 = vld [vmem:[#allocation2 + $0x140] sm:$0xff] }
  0xfa   : > { %v493_v26 = vmax.f32 %v432_v18, 0.0  ;;  %v1132_v18 = vrot.slane %v2774_v13, 1 }
  0xfb   : > { %v1156_v28 = vrot.slane %v2723_v14, 1  ;;  %v1042_v31 = vshll.u32 %v2723_v14, 16 }
  0xfc   : > { %v526_v33 = vmul.f32 %v2557_v40, %v493_v26 }
  0xfd   : > { %1190 = vrot.lane.b32.xlu0 %v1155_v17, %s2340_s13  ;;  %v466_v17 = vpop.f32.mrf.mxu3  ;;  %v2745_v46 = vsel %vm1119_vm6, %v1156_v28, %v1157_v30  ;;  %v1044_v47 = vrot.slane %v1042_v31, 1 }
  0xfe   : > { %1109 = vrot.lane.b32.xlu2 %v1038_v38, %s2339_s12  ;;  %v467_v19 = vadd.f32 %v466_v17, %v2554_v37  ;;  %v559_v42 = vadd.f32 %v2560_v43, %v526_v33 }
  0xff   : > { %v433_v50 = vpop.f32.mrf.mxu0 }
 0x100   : > { %v507_v27 = vmax.f32 %v467_v19, 0.0  ;;  %638 = vst.msk [vmem:[#allocation2 + $0xa9] sm:$0xff] %vm579_vm2, %v559_v42  ;;  %v434_v53 = vadd.f32 %v433_v50, %v2554_v37  ;;  %v1133_v19 = vrot.slane %v2766_v8, 1  ;;  %v738_v42 = vpack.c.bf16 %v697_v32, %v697_v32  ;;  %v1709_v50 = vld [vmem:[%s3624_s3 + $0x20] sm:$0xf]  ;;  %v2215_v32 = vld [vmem:[%s3624_s3 + $0x8] sm:$0xff] }
 0x101   : > { %1174 = vrot.lane.b32.xlu1 %v1131_v54, %s2340_s13 }
 0x102   : > { %v540_v34 = vmul.f32 %v2557_v40, %v507_v27  ;;  %v494_v59 = vmax.f32 %v434_v53, 0.0  ;;  %v2789_v28 = vsel %vm1119_vm6, %v1132_v18, %v1133_v19  ;;  %v824_v55 = vunpack.c.l.b16 %v738_v42  ;;  %v2216_v18 = vld [vmem:[%s3624_s3 + $0x10] sm:$0xff] }
 0x104   : > { %v573_v45 = vadd.f32 %v2560_v43, %v540_v34  ;;  %v527_v1 = vmul.f32 %v2557_v40, %v494_v59 }
 0x105   : > { %1389 = vrot.lane.b32.xlu0 %v1038_v38, %s2346_s30  ;;  %v1040_v38 = vshrl.u32 %v2723_v14, 16  ;;  %v468_v51 = vpop.f32.mrf.mxu3 }
 0x106   : > { %1326 = vrot.lane.b32.xlu2 %v2693_v44, %s2345_s26  ;;  %652 = vst.msk [vmem:[#allocation2 + $0x151] sm:$0xff] %vm579_vm2, %v573_v45  ;;  %v560_v5 = vadd.f32 %v2560_v43, %v527_v1  ;;  %v739_v45 = vpack.c.bf16 %v698_v35, %v698_v35 }
 0x107   : > { %v1045_v62 = vor.u32 %v1044_v47, %v1040_v38  ;;  %v436_v9 = vpop.f32.mrf.mxu0 }
 0x108   : > { %639 = vst.msk [vmem:[#allocation2 + $0xb1] sm:$0xff] %vm579_vm2, %v560_v5  ;;  %v437_v11 = vadd.f32 %v436_v9, %v2554_v37 }
 0x109   : > { %1408 = vrot.lane.b32.xlu1 %v1131_v54, %s2343_s23  ;;  %v2764_v7 = vsel %vm894_vm5, %v1045_v62, %v1049_v63 }
 0x10a   : > { %v495_v16 = vmax.f32 %v437_v11, 0.0 }
 0x10c   : > { %v528_v20 = vmul.f32 %v2557_v40, %v495_v16 }
 0x10d   : > { %1209 = vrot.lane.b32.xlu0 %v2693_v44, %s2341_s16  ;;  %v471_v10 = vpop.f32.mrf.mxu3 }
 0x10e   : > { %1291 = vrot.lane.b32.xlu2 %v1131_v54, %s2342_s17  ;;  %v469_v54 = vadd.f32 %v468_v51, %v2554_v37  ;;  %v472_v12 = vadd.f32 %v471_v10, %v2554_v37  ;;  %v561_v26 = vadd.f32 %v2560_v43, %v528_v20  ;;  %v944_v10 = vshrl.u32 %v2774_v13, 16 }
 0x10f   : > { %v438_v30 = vpop.f32.mrf.mxu0 }
 0x110   : > { %v2732_v24 = vpop.permute.xlu2 %1205  ;;  %v508_v60 = vmax.f32 %v469_v54, 0.0  ;;  %v509_v17 = vmax.f32 %v472_v12, 0.0  ;;  %640 = vst.msk [vmem:[#allocation2 + $0xc1] sm:$0xff] %vm579_vm2, %v561_v26  ;;  %v439_v33 = vadd.f32 %v438_v30, %v2554_v37  ;;  %v1729_v54 = vunpack.c.l.b16 %v1709_v50  ;;  %v673_v30 = vld [vmem:[#allocation2 + $0x78] sm:$0xff] }
 0x111   : > { %1227 = vrot.lane.b32.xlu1 %v2723_v14, %s2341_s16  ;;  %v951_v12 = vshll.u32 %v2766_v8, 16 }
 0x112   : > { %v541_v2 = vmul.f32 %v2557_v40, %v508_v60  ;;  %v542_v22 = vmul.f32 %v2557_v40, %v509_v17  ;;  %v496_v39 = vmax.f32 %v439_v33, 0.0  ;;  %v1734_v59 = vpack.c.b16 %v1729_v54, %v1729_v54 }
 0x113   : > { %v953_v26 = vrot.slane %v951_v12, 1 }
 0x114   : > { %v574_v6 = vadd.f32 %v2560_v43, %v541_v2  ;;  %v575_v27 = vadd.f32 %v2560_v43, %v542_v22  ;;  %v529_v47 = vmul.f32 %v2557_v40, %v496_v39  ;;  %v1774_v0 = vsel %vm1772_vm7, %v1734_v59, 0 }
 0x115   : > { %1344 = vrot.lane.b32.xlu0 %v2723_v14, %s2345_s26  ;;  %v473_v31 = vpop.f32.mrf.mxu3  ;;  %v946_v2 = vshll.u32 %v2774_v13, 16  ;;  %1779 = vmatpush.bf16.msra.mxu1 %v1774_v0  ;;  %v722_v39 = vpack.c.bf16 %v673_v30, %v673_v30 }
 0x116   : > { %1426 = vrot.lane.b32.xlu2 %v2745_v46, %s2343_s23  ;;  %653 = vst.msk [vmem:[#allocation2 + $0x159] sm:$0xff] %vm579_vm2, %v574_v6  ;;  %v474_v34 = vadd.f32 %v473_v31, %v2554_v37  ;;  %v562_v51 = vadd.f32 %v2560_v43, %v529_v47  ;;  %v699_v6 = vld [vmem:[#allocation2 + $0x148] sm:$0x3]  ;;  %2220 = vmatpush.bf16.msra.mxu2 %v1774_v0  ;;  %v674_v31 = vld [vmem:[#allocation2 + $0x80] sm:$0xff] }
 0x117   : > { %654 = vst.msk [vmem:[#allocation2 + $0x169] sm:$0xff] %vm579_vm2, %v575_v27  ;;  %v441_v56 = vpop.f32.mrf.mxu0  ;;  %v948_v11 = vrot.slane %v946_v2, 1  ;;  %v757_v16 = vpack.c.bf16 %v699_v6, %v699_v6  ;;  %v675_v47 = vld [vmem:[#allocation2 + $0x88] sm:$0x3]  ;;  %v808_v54 = vunpack.c.l.b16 %v722_v39 }
 0x118   : > { %v2755_v57 = vpop.permute.xlu2 %1170  ;;  %v510_v41 = vmax.f32 %v474_v34, 0.0  ;;  %641 = vst.msk [vmem:[#allocation2 + $0xc9] sm:$0xff] %vm579_vm2, %v562_v51 }
 0x119   : > { %1093 = vrot.lane.b32.xlu1 %v942_v58, %s2339_s12  ;;  %1780 = vmatpush.bf16.msra.mxu1 %v2217_v3  ;;  %v949_v22 = vor.u32 %v948_v11, %v944_v10  ;;  %v875_v27 = vunpack.c.l.b16 %v757_v16  ;;  %v700_v16 = vld [vmem:[#allocation2 + $0x150] sm:$0xff] }
 0x11a   : > { %v543_v48 = vmul.f32 %v2557_v40, %v510_v41  ;;  %2221 = vmatpush.bf16.msra.mxu2 %v2217_v3  ;;  %v723_v41 = vpack.c.bf16 %v674_v31, %v674_v31  ;;  %v740_v30 = vpack.c.bf16 %v700_v16, %v700_v16 }
 0x11b   : > { %v954_v42 = vsel %vm894_vm5, %v949_v22, %v953_v26  ;;  %v678_v22 = vld [vmem:[#allocation2 + $0xa0] sm:$0x3] }
 0x11c   : > { %v576_v53 = vadd.f32 %v2560_v43, %v543_v48  ;;  %v2214_v48 = vld [vmem:[%s3624_s3] sm:$0xff] }
 0x11d   : > { %1373 = vrot.lane.b32.xlu0 %v942_v58, %s2346_s30  ;;  %1781 = vmatpush.bf16.msra.mxu1 %v2216_v18 }
 0x11e   : > { %1274 = vrot.lane.b32.xlu2 %v2764_v7, %s2344_s25  ;;  %655 = vst.msk [vmem:[#allocation2 + $0x171] sm:$0xff] %vm579_vm2, %v576_v53  ;;  %2222 = vmatpush.bf16.msra.mxu2 %v2216_v18  ;;  %v749_v53 = vpack.c.bf16 %v675_v47, %v675_v47 }
 0x11f   : > { %v443_v17 = vpop.f32.mrf.mxu0 }
 0x120   : > { %v2777_v15 = vpop.permute.xlu2 %1340  ;;  %v867_v0 = vunpack.c.l.b16 %v749_v53 }
 0x121   : > { %1256 = vrot.lane.b32.xlu1 %v942_v58, %s2344_s25  ;;  %v442_v58 = vadd.f32 %v441_v56, %v2554_v37  ;;  %1782 = vmatpush.bf16.msra.mxu1 %v2215_v32 }
 0x122   : > { %2223 = vmatpush.bf16.msra.mxu2 %v2215_v32  ;;  %v883_v18 = vpack.c.b16 %v867_v0, %v867_v0  ;;  %v750_v32 = vpack.c.bf16 %v678_v22, %v678_v22 }
 0x123   : > { %v497_v63 = vmax.f32 %v442_v58, 0.0 }
 0x125   : > { %1309 = vrot.lane.b32.xlu0 %v2745_v46, %s2342_s17  ;;  %v530_v9 = vmul.f32 %v2557_v40, %v497_v63  ;;  %1783 = vmatpush.bf16.msra.mxu1 %v2214_v48 }
 0x126   : > { %1176 = vrot.lane.b32.xlu2 %v2789_v28, %s2340_s13  ;;  %2224 = vmatpush.bf16.msra.mxu2 %v2214_v48  ;;  %v826_v48 = vunpack.c.l.b16 %v740_v30 }
 0x128   : > { %v2801_v38 = vpop.permute.xlu2 %1223 }
 0x129   : > { %1192 = vrot.lane.b32.xlu1 %v2745_v46, %s2340_s13  ;;  %v825_v46 = vunpack.c.l.b16 %v739_v45  ;;  %v891_v45 = vpack.c.b16 %v875_v27, %v875_v27  ;;  %v702_v27 = vld [vmem:[#allocation2 + $0x160] sm:$0x3] }
 0x12a   : > { %v758_v47 = vpack.c.bf16 %v702_v27, %v702_v27 }
 0x12b   : > { %v2807_v49 = vpop.permute.xlu1 %1287  ;;  %v2831_v4 = vpack.c.b16 %v825_v46, %v824_v55  ;;  %v809_v55 = vunpack.c.l.b16 %v723_v41  ;;  %v1160_v56 = vrot.slane %v891_v45, 1  ;;  %v1059_v3 = vshll.u32 %v891_v45, 16 }
 0x12d   : > { %1111 = vrot.lane.b32.xlu0 %v2764_v7, %s2339_s12  ;;  %3630 = vst [vmem:[#allocation6_spill] sm:$0xff] %v2831_v4  ;;  %v1054_v46 = vshll.u32 %v2831_v4, 16  ;;  %v2884_v63 = vpack.c.b16 %v809_v55, %v808_v54  ;;  %v1439_v54 = vsel %vm579_vm2, %v2482_v21, %v2799_v36  ;;  %v679_v36 = vld [vmem:[#allocation2 + $0xa8] sm:$0xff] }
 0x12e   : > { %1410 = vrot.lane.b32.xlu2 %v2789_v28, %s2343_s23  ;;  %v726_v27 = vpack.c.bf16 %v679_v36, %v679_v36 }
 0x12f   : > { %v1090_v60 = vpop.permute.xlu0 %1089  ;;  %v1056_v2 = vrot.slane %v1054_v46, 1  ;;  %v956_v41 = vshrl.u32 %v2884_v63, 16  ;;  %v868_v46 = vunpack.c.l.b16 %v750_v32 }
 0x130   : > { %v2821_v62 = vpop.permute.xlu2 %1188  ;;  %v1441_v1 = vsel %vm579_vm2, %v2589_v23, %v1090_v60  ;;  %v1052_v60 = vshrl.u32 %v2831_v4, 16 }
 0x131   : > { %1391 = vrot.lane.b32.xlu1 %v2764_v7, %s2346_s30  ;;  %v2835_v5 = vsel %vm1470_vm8, %v1441_v1, %v2755_v57  ;;  %v563_v7 = vadd.f32 %v2560_v43, %v530_v9  ;;  %v444_v57 = vadd.f32 %v443_v17, %v2554_v37  ;;  %v676_v9 = vld [vmem:[#allocation2 + $0x90] sm:$0xff]  ;;  %v701_v17 = vld [vmem:[#allocation2 + $0x158] sm:$0xff]  ;;  %v2926_v16 = vpack.c.b16 %v868_v46, %v868_v46 }
 0x132   : > { %v724_v11 = vpack.c.bf16 %v676_v9, %v676_v9  ;;  %v741_v31 = vpack.c.bf16 %v701_v17, %v701_v17  ;;  %v704_v9 = vld [vmem:[#allocation2 + $0x170] sm:$0xff] }
 0x133   : > { %v2838_v23 = vpop.permute.xlu1 %1422  ;;  %642 = vst.msk [vmem:[#allocation2 + $0xd9] sm:$0xff] %vm579_vm2, %v563_v7  ;;  %v498_v20 = vmax.f32 %v444_v57, 0.0  ;;  %v677_v7 = vld [vmem:[#allocation2 + $0x98] sm:$0xff]  ;;  %v1057_v57 = vor.u32 %v1056_v2, %v1052_v60  ;;  %v876_v2 = vunpack.c.l.b16 %v758_v47  ;;  %v743_v22 = vpack.c.bf16 %v704_v9, %v704_v9 }
 0x134   : > { %v725_v12 = vpack.c.bf16 %v677_v7, %v677_v7  ;;  %v827_v53 = vunpack.c.l.b16 %v741_v31  ;;  %v975_v47 = vshll.u32 %v2926_v16, 16 }
 0x135   : > { %1328 = vrot.lane.b32.xlu0 %v2774_v13, %s2345_s26  ;;  %v531_v33 = vmul.f32 %v2557_v40, %v498_v20  ;;  %v958_v20 = vshll.u32 %v2884_v63, 16 }
 0x136   : > { %1229 = vrot.lane.b32.xlu2 %v2831_v4, %s2341_s16  ;;  %v2922_v21 = vpack.c.b16 %v827_v53, %v826_v48  ;;  %v682_v53 = vld [vmem:[#allocation2 + $0xc0] sm:$0xff] }
 0x137   : > { %v2852_v19 = vpop.permute.xlu0 %1252  ;;  %v564_v35 = vadd.f32 %v2560_v43, %v531_v33  ;;  %v810_v33 = vunpack.c.l.b16 %v724_v11  ;;  %v960_v45 = vrot.slane %v958_v20, 1  ;;  %v680_v11 = vld [vmem:[#allocation2 + $0xb0] sm:$0xff] }
 0x138   : > { %v2854_v8 = vpop.permute.xlu2 %1324  ;;  %v727_v30 = vpack.c.bf16 %v680_v11, %v680_v11  ;;  %v1066_v32 = vshll.u32 %v2922_v21, 16  ;;  %v1064_v36 = vshrl.u32 %v2922_v21, 16 }
 0x139   : > { %1211 = vrot.lane.b32.xlu1 %v2774_v13, %s2341_s16  ;;  %643 = vst.msk [vmem:[#allocation2 + $0xe1] sm:$0xff] %vm579_vm2, %v564_v35  ;;  %v811_v35 = vunpack.c.l.b16 %v725_v12  ;;  %v961_v60 = vor.u32 %v960_v45, %v956_v41  ;;  %v1472_v12 = vsel %vm1470_vm8, %v1439_v54, %v2784_v25  ;;  %v2939_v25 = vpack.c.b16 %v876_v2, %v876_v2 }
 0x13a   : > { %v1505_v31 = vsel %vm1503_vm9, %v1472_v12, %v2732_v24  ;;  %v812_v2 = vunpack.c.l.b16 %v726_v27  ;;  %v1068_v11 = vrot.slane %v1066_v32, 1 }
 0x13b   : > { %v2862_v34 = vpop.permute.xlu1 %1305  ;;  %v1538_v54 = vsel %vm1536_vm10, %v1505_v31, %v2852_v19  ;;  %v728_v19 = vpack.c.bf16 %v682_v53, %v682_v53 }
 0x13d   : > { %1293 = vrot.lane.b32.xlu0 %v2789_v28, %s2342_s17  ;;  %v1159_v28 = vrot.slane %v2831_v4, 1 }
 0x13e   : > { %1095 = vrot.lane.b32.xlu2 %v954_v42, %s2339_s12 }
 0x13f   : > { %v2873_v50 = vpop.permute.xlu0 %1387  ;;  %v2887_v1 = vsel %vm1119_vm6, %v1159_v28, %v1160_v56  ;;  %v2915_v56 = vpack.c.b16 %v811_v35, %v810_v33  ;;  %v681_v33 = vld [vmem:[#allocation2 + $0xb8] sm:$0x3] }
 0x140   : > { %v2875_v51 = vpop.permute.xlu2 %1207 }
 0x141   : > { %1346 = vrot.lane.b32.xlu1 %v2831_v4, %s2345_s26  ;;  %v970_v17 = vshll.u32 %v2915_v56, 16  ;;  %v968_v45 = vshrl.u32 %v2915_v56, 16 }
 0x143   : > { %v1108_v58 = vpop.permute.xlu1 %1107 }
 0x144   : > { %v1459_v59 = vsel %vm579_vm2, %v2605_v52, %v1108_v58  ;;  %v1135_v58 = vrot.slane %v2884_v63, 1 }
 0x145   : > { %v2891_v6 = vsel %vm1470_vm8, %v1459_v59, %v2821_v62  ;;  %1428 = vrot.lane.b32.xlu0 %v2887_v1, %s2343_s23  ;;  %v1061_v62 = vrot.slane %v1059_v3, 1  ;;  %v1136_v59 = vrot.slane %v883_v18, 1  ;;  %v703_v3 = vld [vmem:[#allocation2 + $0x168] sm:$0xff] }
 0x146   : > { %1258 = vrot.lane.b32.xlu2 %v954_v42, %s2344_s25  ;;  %v742_v20 = vpack.c.bf16 %v703_v3, %v703_v3  ;;  %v813_v3 = vunpack.c.l.b16 %v727_v30 }
 0x147   : > { %v2896_v52 = vpop.permute.xlu0 %1270  ;;  %v1062_v39 = vsel %vm894_vm5, %v1057_v57, %v1061_v62  ;;  %v2930_v57 = vsel %vm1119_vm6, %v1135_v58, %v1136_v59  ;;  %v829_v58 = vunpack.c.l.b16 %v743_v22  ;;  %v683_v59 = vld [vmem:[#allocation2 + $0xc8] sm:$0xff]  ;;  %v977_v22 = vrot.slane %v975_v47, 1 }
 0x148   : > { %v2898_v10 = vpop.permute.xlu2 %1342  ;;  %v828_v46 = vunpack.c.l.b16 %v742_v20  ;;  %v814_v47 = vunpack.c.l.b16 %v728_v19 }
 0x149   : > { %1375 = vrot.lane.b32.xlu1 %v954_v42, %s2346_s30  ;;  %v963_v42 = vshll.u32 %v883_v18, 16  ;;  %v705_v18 = vld [vmem:[#allocation2 + $0x178] sm:$0x3] }
 0x14a   : > { %v759_v48 = vpack.c.bf16 %v705_v18, %v705_v18  ;;  %v729_v18 = vpack.c.bf16 %v683_v59, %v683_v59  ;;  %v2961_v31 = vpack.c.b16 %v829_v58, %v828_v46  ;;  %v1138_v46 = vrot.slane %v2915_v56, 1  ;;  %v685_v58 = vld [vmem:[#allocation2 + $0xd8] sm:$0xff]  ;;  %v686_v59 = vld [vmem:[#allocation2 + $0xe0] sm:$0xff] }
 0x14b   : > { %v2902_v26 = vpop.permute.xlu1 %1406  ;;  %v965_v0 = vrot.slane %v963_v42, 1  ;;  %v972_v42 = vrot.slane %v970_v17, 1  ;;  %v684_v17 = vld [vmem:[#allocation2 + $0xd0] sm:$0x3] }
 0x14c   : > { %v877_v12 = vunpack.c.l.b16 %v759_v48  ;;  %v815_v48 = vunpack.c.l.b16 %v729_v18  ;;  %v731_v18 = vpack.c.bf16 %v686_v59, %v686_v59 }
 0x14d   : > { %1276 = vrot.lane.b32.xlu0 %v1062_v39, %s2344_s25  ;;  %v2933_v62 = vsel %vm894_vm5, %v961_v60, %v965_v0  ;;  %v1071_v60 = vshll.u32 %v2939_v25, 16  ;;  %v751_v0 = vpack.c.bf16 %v681_v33, %v681_v33  ;;  %v973_v20 = vor.u32 %v972_v42, %v968_v45 }
 0x14e   : > { %1393 = vrot.lane.b32.xlu2 %v1062_v39, %s2346_s30  ;;  %v1069_v33 = vor.u32 %v1068_v11, %v1064_v36  ;;  %v2977_v42 = vpack.c.b16 %v877_v12, %v877_v12  ;;  %v2998_v11 = vpack.c.b16 %v815_v48, %v814_v47  ;;  %v687_v12 = vld [vmem:[#allocation2 + $0xe8] sm:$0x3] }
 0x14f   : > { %v2911_v55 = vpop.permute.xlu0 %1172  ;;  %v869_v30 = vunpack.c.l.b16 %v751_v0  ;;  %v2990_v0 = vsel %vm894_vm5, %v973_v20, %v977_v22  ;;  %v753_v48 = vpack.c.bf16 %v687_v12, %v687_v12 }
 0x150   : > { %v2913_v28 = vpop.permute.xlu2 %1307 }
 0x151   : > { %1311 = vrot.lane.b32.xlu1 %v2887_v1, %s2342_s17 }
 0x153   : > { %v2920_v7 = vpop.permute.xlu1 %1289 }
 0x155   : > { %1178 = vrot.lane.b32.xlu0 %v2930_v57, %s2340_s13 }
 0x156   : > { %1097 = vrot.lane.b32.xlu2 %v2933_v62, %s2339_s12 }
 0x157   : > { %v1226_v35 = vpop.permute.xlu0 %1225 }
 0x158   : > { %v2944_v41 = vpop.permute.xlu2 %1109  ;;  %v2952_v24 = vsel %vm1503_vm9, %v2891_v6, %v1226_v35  ;;  %v1571_v6 = vsel %vm1569_vm11, %v1538_v54, %v2807_v49  ;;  %v1073_v49 = vrot.slane %v1071_v60, 1  ;;  %v752_v35 = vpack.c.bf16 %v684_v17, %v684_v17 }
 0x159   : > { %1113 = vrot.lane.b32.xlu1 %v1062_v39, %s2339_s12  ;;  %v1604_v32 = vsel %vm1602_vm12, %v1571_v6, %v2854_v8  ;;  %v1078_v54 = vshll.u32 %v2961_v31, 16  ;;  %v1076_v6 = vshrl.u32 %v2961_v31, 16  ;;  %v730_v17 = vpack.c.bf16 %v685_v58, %v685_v58 }
 0x15a   : > { %v2995_v36 = vsel %vm894_vm5, %v1069_v33, %v1073_v49  ;;  %v870_v19 = vunpack.c.l.b16 %v752_v35  ;;  %v817_v58 = vunpack.c.l.b16 %v731_v18  ;;  %v1461_v18 = vsel %vm579_vm2, %v2660_v61, %v2944_v41 }
 0x15b   : > { %v1092_v9 = vpop.permute.xlu1 %1091 }
 0x15c   : > { %v1443_v39 = vsel %vm579_vm2, %v2637_v29, %v1092_v9  ;;  %v2971_v29 = vpack.c.b16 %v813_v3, %v812_v2  ;;  %v1139_v2 = vrot.slane %v2926_v16, 1  ;;  %v885_v3 = vpack.c.b16 %v869_v30, %v869_v30 }
 0x15d   : > { %v2965_v27 = vsel %vm1470_vm8, %v1443_v39, %v2911_v55  ;;  %1412 = vrot.lane.b32.xlu0 %v2930_v57, %s2343_s23  ;;  %v1080_v39 = vrot.slane %v1078_v54, 1  ;;  %v886_v47 = vpack.c.b16 %v870_v19, %v870_v19  ;;  %v994_v54 = vshll.u32 %v2998_v11, 16 }
 0x15e   : > { %1377 = vrot.lane.b32.xlu2 %v2933_v62, %s2346_s30  ;;  %v982_v9 = vshll.u32 %v2971_v29, 16  ;;  %v1141_v16 = vrot.slane %v2971_v29, 1  ;;  %v1142_v20 = vrot.slane %v885_v3, 1  ;;  %v980_v22 = vshrl.u32 %v2971_v29, 16 }
 0x15f   : > { %v1372_v45 = vpop.permute.xlu0 %1371  ;;  %v987_v30 = vshll.u32 %v885_v3, 16  ;;  %v3012_v35 = vsel %vm1119_vm6, %v1138_v46, %v1139_v2  ;;  %v992_v2 = vshrl.u32 %v2998_v11, 16  ;;  %v871_v19 = vunpack.c.l.b16 %v753_v48 }
 0x160   : > { %v2975_v55 = vpop.permute.xlu2 %1326  ;;  %v1637_v53 = vsel %vm1635_vm13, %v1604_v32, %v1372_v45  ;;  %v984_v49 = vrot.slane %v982_v9, 1  ;;  %v3018_v3 = vsel %vm1119_vm6, %v1141_v16, %v1142_v20 }
 0x161   : > { %1330 = vrot.lane.b32.xlu1 %v2884_v63, %s2345_s26  ;;  %v1670_v8 = vsel %vm1668_vm14, %v1637_v53, %v2902_v26  ;;  %v1083_v26 = vshll.u32 %v2977_v42, 16  ;;  %v1081_v53 = vor.u32 %v1080_v39, %v1076_v6  ;;  %v989_v4 = vrot.slane %v987_v30, 1 }
 0x162   : > { %2176 = vmatmul.msk.bf16.vlgmr.msra.gmra.mxu1 %vm1739_vm15, %v1670_v8  ;;  %v816_v8 = vunpack.c.l.b16 %v730_v17  ;;  %v985_v9 = vor.u32 %v984_v49, %v980_v22  ;;  %v996_v6 = vrot.slane %v994_v54, 1  ;;  %v1144_v22 = vrot.slane %v2998_v11, 1 }
 0x163   : > { %v2987_v60 = vpop.permute.xlu1 %1424  ;;  %v1085_v45 = vrot.slane %v1083_v26, 1  ;;  %v999_v26 = vshll.u32 %v886_v47, 16  ;;  %v1145_v49 = vrot.slane %v886_v47, 1 }
 0x164   : > { %v3026_v39 = vpack.c.b16 %v817_v58, %v816_v8 }
 0x165   : > { %1099 = vrot.lane.b32.xlu0 %v2990_v0, %s2339_s12  ;;  %v3024_v12 = vsel %vm894_vm5, %v1081_v53, %v1085_v45  ;;  %v997_v45 = vor.u32 %v996_v6, %v992_v2  ;;  %v1001_v48 = vrot.slane %v999_v26, 1  ;;  %v3048_v54 = vsel %vm1119_vm6, %v1144_v22, %v1145_v49 }
 0x166   : > { %1115 = vrot.lane.b32.xlu2 %v2995_v36, %s2339_s12  ;;  %v1147_v61 = vrot.slane %v3026_v39, 1  ;;  %v1004_v47 = vshrl.u32 %v3026_v39, 16 }
 0x167   : > { %v3007_v32 = vpop.permute.xlu0 %1254  ;;  %v3052_v8 = vsel %vm894_vm5, %v997_v45, %v1001_v48  ;;  %v1162_v45 = vrot.slane %v2922_v21, 1  ;;  %v1163_v48 = vrot.slane %v2939_v25, 1  ;;  %v1507_v25 = vsel %vm1503_vm9, %v2835_v5, %v2875_v51 }
 0x168   : > { %v3009_v33 = vpop.permute.xlu2 %1291 }
 0x169   : > { %1180 = vrot.lane.b32.xlu1 %v3012_v35, %s2340_s13 }
 0x16b   : > { %v1273_v59 = vpop.permute.xlu1 %1272 }
 0x16c   : > { %v1558_v46 = vsel %vm1536_vm10, %v2952_v24, %v1273_v59  ;;  %v3035_v24 = vsel %vm894_vm5, %v985_v9, %v989_v4  ;;  %v1006_v4 = vshll.u32 %v3026_v39, 16 }
 0x16d   : > { %v1591_v17 = vsel %vm1569_vm11, %v1558_v46, %v2913_v28  ;;  %1117 = vrot.lane.b32.xlu0 %v3024_v12, %s2339_s12  ;;  %v887_v28 = vpack.c.b16 %v871_v19, %v871_v19 }
 0x16e   : > { %1182 = vrot.lane.b32.xlu2 %v3018_v3, %s2340_s13  ;;  %v1008_v58 = vrot.slane %v1006_v4, 1 }
 0x16f   : > { %v1191_v16 = vpop.permute.xlu0 %1190  ;;  %v1148_v41 = vrot.slane %v887_v28, 1  ;;  %v1011_v59 = vshll.u32 %v887_v28, 16 }
 0x170   : > { %v3040_v20 = vpop.permute.xlu2 %1426  ;;  %v1494_v30 = vsel %vm1470_vm8, %v1461_v18, %v1191_v16  ;;  %v1009_v26 = vor.u32 %v1008_v58, %v1004_v47 }
 0x171   : > { %1101 = vrot.lane.b32.xlu1 %v3035_v24, %s2339_s12  ;;  %v3062_v2 = vsel %vm1119_vm6, %v1147_v61, %v1148_v41  ;;  %v1013_v19 = vrot.slane %v1011_v59, 1  ;;  %v476_v61 = vpop.f32.mrf.mxu3 }
 0x172   : > { %v477_v41 = vadd.f32 %v476_v61, %v2554_v37 }
 0x173   : > { %v1175_v53 = vpop.permute.xlu1 %1174  ;;  %v3067_v18 = vsel %vm894_vm5, %v1009_v26, %v1013_v19  ;;  %v1540_v26 = vsel %vm1536_vm10, %v1507_v25, %v3007_v32 }
 0x175   : > { %1184 = vrot.lane.b32.xlu0 %v3048_v54, %s2340_s13 }
 0x176   : > { %1103 = vrot.lane.b32.xlu2 %v3052_v8, %s2339_s12 }
 0x177   : > { %v3059_v9 = vpop.permute.xlu0 %1389 }
 0x178   : > { %v1275_v46 = vpop.permute.xlu2 %1274 }
 0x179   : > { %1186 = vrot.lane.b32.xlu1 %v3062_v2, %s2340_s13  ;;  %v478_v32 = vpop.f32.mrf.mxu3 }
 0x17b   : > { %v1409_v6 = vpop.permute.xlu1 %1408 }
 0x17d   : > { %1105 = vrot.lane.b32.xlu0 %v3067_v18, %s2339_s12 }
 0x17e   : > { %1221 = vrot.lane.b32.xlu2 %v3026_v39, %s2341_s16 }
 0x17f   : > { %v3073_v16 = vpop.permute.xlu0 %1209 }
 0x180   : > { %v1177_v22 = vpop.permute.xlu2 %1176 }
 0x181   : > { %1303 = vrot.lane.b32.xlu1 %v3062_v2, %s2342_s17 }
 0x183   : > { %v1228_v49 = vpop.permute.xlu1 %1227 }
 0x184   : > { %v1527_v28 = vsel %vm1503_vm9, %v1494_v30, %v1228_v49  ;;  %v3089_v30 = vsel %vm1119_vm6, %v1162_v45, %v1163_v48  ;;  %v1573_v45 = vsel %vm1569_vm11, %v1540_v26, %v2920_v7 }
 0x185   : > { %v1560_v4 = vsel %vm1536_vm10, %v1527_v28, %v1275_v46  ;;  %1268 = vrot.lane.b32.xlu0 %v3067_v18, %s2344_s25  ;;  %v511_v46 = vmax.f32 %v477_v41, 0.0 }
 0x186   : > { %1348 = vrot.lane.b32.xlu2 %v2922_v21, %s2345_s26 }
 0x187   : > { %v1345_v47 = vpop.permute.xlu0 %1344  ;;  %v544_v49 = vmul.f32 %v2557_v40, %v511_v46 }
 0x188   : > { %v3086_v58 = vpop.permute.xlu2 %1410  ;;  %v1624_v59 = vsel %vm1602_vm12, %v1591_v17, %v1345_v47  ;;  %v479_v17 = vadd.f32 %v478_v32, %v2554_v37 }
 0x189   : > { %1430 = vrot.lane.b32.xlu1 %v3089_v30, %s2343_s23  ;;  %v577_v5 = vadd.f32 %v2560_v43, %v544_v49 }
 0x18b   : > { %v1094_v19 = vpop.permute.xlu1 %1093  ;;  %656 = vst.msk [vmem:[#allocation2 + $0x181] sm:$0xff] %vm579_vm2, %v577_v5 }
 0x18c   : > { %v1445_v28 = vsel %vm579_vm2, %v2693_v44, %v1094_v19  ;;  %v1606_v44 = vsel %vm1602_vm12, %v1573_v45, %v2975_v55  ;;  %v1166_v45 = vrot.slane %v2977_v42, 1 }
 0x18d   : > { %v3106_v51 = vsel %vm1470_vm8, %v1445_v28, %v1175_v53  ;;  %1395 = vrot.lane.b32.xlu0 %v2995_v36, %s2346_s30  ;;  %v512_v53 = vmax.f32 %v479_v17, 0.0 }
 0x18e   : > { %1213 = vrot.lane.b32.xlu2 %v2884_v63, %s2341_s16 }
 0x18f   : > { %v1374_v7 = vpop.permute.xlu0 %1373  ;;  %v545_v25 = vmul.f32 %v2557_v40, %v512_v53 }
 0x190   : > { %v1230_v48 = vpop.permute.xlu2 %1229  ;;  %v1639_v61 = vsel %vm1635_vm13, %v1606_v44, %v1374_v7 }
 0x191   : > { %1295 = vrot.lane.b32.xlu1 %v2930_v57, %s2342_s17  ;;  %v1672_v41 = vsel %vm1668_vm14, %v1639_v61, %v1409_v6  ;;  %v578_v37 = vadd.f32 %v2560_v43, %v545_v25 }
 0x192   : > { %2177 = vmatmul.msk.bf16.gmra.mxu1 %vm1739_vm15, %v1672_v41  ;;  %v706_v17 = vld [vmem:[#allocation2 + $0x180] sm:$0xff]  ;;  %v1509_v41 = vsel %vm1503_vm9, %v2965_v27, %v3073_v16 }
 0x193   : > { %v1257_v47 = vpop.permute.xlu1 %1256  ;;  %657 = vst.msk [vmem:[#allocation2 + $0x189] sm:$0xff] %vm579_vm2, %v578_v37 }
 0x194   : > { %v1542_v25 = vsel %vm1536_vm10, %v1509_v41, %v1257_v47 }
 0x195   : > { %1260 = vrot.lane.b32.xlu0 %v2933_v62, %s2344_s25  ;;  %v1575_v27 = vsel %vm1569_vm11, %v1542_v25, %v3009_v33 }
 0x196   : > { %1332 = vrot.lane.b32.xlu2 %v2915_v56, %s2345_s26 }
 0x197   : > { %v1310_v55 = vpop.permute.xlu0 %1309 }
 0x198   : > { %v1096_v57 = vpop.permute.xlu2 %1095  ;;  %v1593_v46 = vsel %vm1569_vm11, %v1560_v4, %v1310_v55 }
 0x199   : > { %v1447_v6 = vsel %vm579_vm2, %v2774_v13, %v1096_v57  ;;  %1414 = vrot.lane.b32.xlu1 %v3012_v35, %s2343_s23 }
 0x19a   : > { %v3134_v40 = vsel %vm1470_vm8, %v1447_v6, %v1177_v22  ;;  %v707_v44 = vld [vmem:[#allocation2 + $0x188] sm:$0xff] }
 0x19b   : > { %v1193_v43 = vpop.permute.xlu1 %1192  ;;  %v761_v61 = vpack.c.bf16 %v707_v44, %v707_v44 }
 0x19d   : > { %1379 = vrot.lane.b32.xlu0 %v2990_v0, %s2346_s30 }
 0x19e   : > { %1194 = vrot.lane.b32.xlu2 %v2887_v1, %s2340_s13 }
 0x19f   : > { %v1112_v62 = vpop.permute.xlu0 %1111 }
 0x1a0   : > { %v3140_v26 = vpop.permute.xlu2 %1258  ;;  %v1463_v4 = vsel %vm579_vm2, %v2723_v14, %v1112_v62 }
 0x1a1   : > { %1278 = vrot.lane.b32.xlu1 %v2995_v36, %s2344_s25  ;;  %v1496_v13 = vsel %vm1470_vm8, %v1463_v4, %v1193_v43  ;;  %v1165_v36 = vrot.slane %v2961_v31, 1 }
 0x1a2   : > { %v1529_v19 = vsel %vm1503_vm9, %v1496_v13, %v1230_v48  ;;  %v760_v48 = vpack.c.bf16 %v706_v17, %v706_v17 }
 0x1a3   : > { %v1392_v22 = vpop.permute.xlu1 %1391  ;;  %v3162_v5 = vsel %vm1119_vm6, %v1165_v36, %v1166_v45 }
 0x1a4   : > { %v1657_v49 = vsel %vm1635_vm13, %v1624_v59, %v1392_v22  ;;  %v1202_v57 = vunpack.c.l.b16 %v760_v48 }
 0x1a5   : > { %v3151_v28 = vsel %vm1668_vm14, %v1657_v49, %v3040_v20  ;;  %1231 = vrot.lane.b32.xlu0 %v2922_v21, %s2341_s16 }
 0x1a6   : > { %1313 = vrot.lane.b32.xlu2 %v3089_v30, %s2342_s17 }
 0x1a7   : > { %v1329_v14 = vpop.permute.xlu0 %1328 }
 0x1a8   : > { %v1394_v1 = vpop.permute.xlu2 %1393  ;;  %v1608_v16 = vsel %vm1602_vm12, %v1575_v27, %v1329_v14 }
 0x1a9   : > { %1397 = vrot.lane.b32.xlu1 %v3024_v12, %s2346_s30 }
 0x1ab   : > { %v1212_v59 = vpop.permute.xlu1 %1211 }
 0x1ad   : > { %1350 = vrot.lane.b32.xlu0 %v2961_v31, %s2345_s26 }
 0x1ae   : > { %1432 = vrot.lane.b32.xlu2 %v3162_v5, %s2343_s23 }
 0x1af   : > { %v3168_v20 = vpop.permute.xlu0 %1293 }
 0x1b0   : > { %v1098_v32 = vpop.permute.xlu2 %1097 }
 0x1b1   : > { %1262 = vrot.lane.b32.xlu1 %v2990_v0, %s2344_s25  ;;  %v708_v0 = vld [vmem:[#allocation2 + $0x190] sm:$0x3] }
 0x1b2   : > { %v762_v6 = vpack.c.bf16 %v708_v0, %v708_v0 }
 0x1b3   : > { %v1347_v7 = vpop.permute.xlu1 %1346 }
 0x1b4   : > { %v1626_v42 = vsel %vm1602_vm12, %v1593_v46, %v1347_v7  ;;  %v1203_v46 = vunpack.c.l.b16 %v761_v61  ;;  %v1238_v13 = vunpack.c.l.b16 %v762_v6 }
 0x1b5   : > { %v1659_v53 = vsel %vm1635_vm13, %v1626_v42, %v1394_v1  ;;  %1215 = vrot.lane.b32.xlu0 %v2915_v56, %s2341_s16 }
 0x1b6   : > { %1297 = vrot.lane.b32.xlu2 %v3012_v35, %s2342_s17  ;;  %v3193_v4 = vpack.c.b16 %v1203_v46, %v1202_v57 }
 0x1b7   : > { %v1429_v37 = vpop.permute.xlu0 %1428 }
 0x1b8   : > { %v1378_v55 = vpop.permute.xlu2 %1377  ;;  %v3185_v43 = vsel %vm1668_vm14, %v1659_v53, %v1429_v37  ;;  %v1243_v14 = vshll.u32 %v3193_v4, 16  ;;  %v1241_v45 = vshrl.u32 %v3193_v4, 16  ;;  %v1284_v0 = vrot.slane %v3193_v4, 1 }
 0x1b9   : > { %1381 = vrot.lane.b32.xlu1 %v3035_v24, %s2346_s30 }
 0x1ba   : > { %v1245_v17 = vrot.slane %v1243_v14, 1 }
 0x1bb   : > { %v1376_v35 = vpop.permute.xlu1 %1375 }
 0x1bc   : > { %v1641_v62 = vsel %vm1635_vm13, %v1608_v16, %v1376_v35  ;;  %v1246_v61 = vor.u32 %v1245_v17, %v1241_v45  ;;  %v710_v35 = vld [vmem:[#allocation2 + $0x1a0] sm:$0xff] }
 0x1bd   : > { %v1674_v47 = vsel %vm1668_vm14, %v1641_v62, %v3086_v58  ;;  %1334 = vrot.lane.b32.xlu0 %v2971_v29, %s2345_s26  ;;  %v1239_v58 = vpack.c.b16 %v1238_v13, %v1238_v13  ;;  %v764_v13 = vpack.c.bf16 %v710_v35, %v710_v35 }
 0x1be   : > { %1416 = vrot.lane.b32.xlu2 %v3018_v3, %s2343_s23  ;;  %2178 = vmatmul.msk.bf16.gmra.mxu1 %vm1739_vm15, %v1674_v47 }
 0x1bf   : > { %v1277_v33 = vpop.permute.xlu0 %1276  ;;  %v1248_v44 = vshll.u32 %v1239_v58, 16  ;;  %v1285_v25 = vrot.slane %v1239_v58, 1  ;;  %v1322_v45 = vunpack.c.l.b16 %v764_v13 }
 0x1c0   : > { %v3200_v22 = vpop.permute.xlu2 %1115  ;;  %v1562_v49 = vsel %vm1536_vm10, %v1529_v19, %v1277_v33  ;;  %v1449_v19 = vsel %vm579_vm2, %v2884_v63, %v1098_v32  ;;  %v1511_v63 = vsel %vm1503_vm9, %v3106_v51, %v1212_v59  ;;  %v711_v33 = vld [vmem:[#allocation2 + $0x1a8] sm:$0x3] }
 0x1c1   : > { %1233 = vrot.lane.b32.xlu1 %v2961_v31, %s2341_s16  ;;  %v1250_v53 = vrot.slane %v1248_v44, 1  ;;  %v1544_v37 = vsel %vm1536_vm10, %v1511_v63, %v3140_v26  ;;  %v1286_v51 = vsel %vm1119_vm6, %v1284_v0, %v1285_v25  ;;  %v765_v14 = vpack.c.bf16 %v711_v33, %v711_v33 }
 0x1c2   : > { %v1577_v57 = vsel %vm1569_vm11, %v1544_v37, %v3168_v20  ;;  %v709_v20 = vld [vmem:[#allocation2 + $0x198] sm:$0xff] }
 0x1c3   : > { %v1312_v1 = vpop.permute.xlu1 %1311  ;;  %v763_v47 = vpack.c.bf16 %v709_v20, %v709_v20 }
 0x1c4   : > { %v1595_v36 = vsel %vm1569_vm11, %v1562_v49, %v1312_v1 }
 0x1c5   : > { %1196 = vrot.lane.b32.xlu0 %v3089_v30, %s2340_s13  ;;  %v3222_v30 = vsel %vm894_vm5, %v1246_v61, %v1250_v53  ;;  %v1321_v1 = vunpack.c.l.b16 %v763_v47  ;;  %v1357_v61 = vunpack.c.l.b16 %v765_v14 }
 0x1c6   : > { %1280 = vrot.lane.b32.xlu2 %v3024_v12, %s2344_s25 }
 0x1c7   : > { %v1179_v7 = vpop.permute.xlu0 %1178  ;;  %v1323_v0 = vpack.c.b16 %v1322_v45, %v1321_v1 }
 0x1c8   : > { %v1183_v42 = vpop.permute.xlu2 %1182  ;;  %v3215_v48 = vsel %vm1470_vm8, %v1449_v19, %v1179_v7 }
 0x1c9   : > { %1352 = vrot.lane.b32.xlu1 %v3193_v4, %s2345_s26  ;;  %v1360_v35 = vshrl.u32 %v1323_v0, 16 }
 0x1cb   : > { %v3219_v41 = vpop.permute.xlu1 %1113 }
 0x1cd   : > { %1315 = vrot.lane.b32.xlu0 %v3162_v5, %s2342_s17 }
 0x1ce   : > { %1399 = vrot.lane.b32.xlu2 %v3222_v30, %s2346_s30 }
 0x1cf   : > { %v1413_v12 = vpop.permute.xlu0 %1412 }
 0x1d0   : > { %v3230_v32 = vpop.permute.xlu2 %1103 }
 0x1d1   : > { %1217 = vrot.lane.b32.xlu1 %v2971_v29, %s2341_s16 }
 0x1d3   : > { %v1331_v46 = vpop.permute.xlu1 %1330 }
 0x1d4   : > { %v1610_v6 = vsel %vm1602_vm12, %v1577_v57, %v1331_v46  ;;  %v1362_v46 = vshll.u32 %v1323_v0, 16 }
 0x1d5   : > { %v1643_v59 = vsel %vm1635_vm13, %v1610_v6, %v1378_v55  ;;  %1434 = vrot.lane.b32.xlu0 %v1286_v51, %s2343_s23  ;;  %v1710_v55 = vld [vmem:[%s3625_s4] sm:$0x7] }
 0x1d6   : > { %1264 = vrot.lane.b32.xlu2 %v3035_v24, %s2344_s25  ;;  %v1676_v27 = vsel %vm1668_vm14, %v1643_v59, %v1413_v12  ;;  %v3259_v58 = vperm.slane %v1710_v55, 0  ;;  %v3269_v19 = vperm.slane %v1710_v55, 1  ;;  %v3278_v63 = vperm.slane %v1710_v55, 2 }
 0x1d7   : > { %2179 = vmatmul.msk.bf16.gmra.mxu1 %vm1739_vm15, %v1676_v27  ;;  %v1100_v26 = vpop.permute.xlu0 %1099  ;;  %v1364_v55 = vrot.slane %v1362_v46, 1 }
 0x1d8   : > { %v3247_v16 = vpop.permute.xlu2 %1221  ;;  %v1451_v24 = vsel %vm579_vm2, %v2915_v56, %v1100_v26 }
 0x1d9   : > { %1336 = vrot.lane.b32.xlu1 %v2998_v11, %s2345_s26  ;;  %v1365_v13 = vor.u32 %v1364_v55, %v1360_v35 }
 0x1db   : > { %v1181_v62 = vpop.permute.xlu1 %1180 }
 0x1dc   : > { %v3257_v49 = vsel %vm1470_vm8, %v1451_v24, %v1181_v62 }
 0x1dd   : > { %1299 = vrot.lane.b32.xlu0 %v3018_v3, %s2342_s17 }
 0x1de   : > { %1383 = vrot.lane.b32.xlu2 %v3052_v8, %s2346_s30 }
 0x1df   : > { %v1785_v56 = vpop.f32.mrf.mxu1  ;;  %v3266_v17 = vpop.permute.xlu0 %1117 }
 0x1e0   : > { %v1786_v44 = vadd.f32 %v1785_v56, %v3259_v58  ;;  %v1349_v7 = vpop.permute.xlu2 %1348 }
 0x1e1   : > { %1198 = vrot.lane.b32.xlu1 %v3162_v5, %s2340_s13  ;;  %v3274_v3 = vsel %vm1602_vm12, %v1595_v36, %v1349_v7  ;;  %v1358_v5 = vpack.c.b16 %v1357_v61, %v1357_v61  ;;  %s3291_s13 = scalar_lea.vmem [#allocation3], %s2077_s11 }
 0x1e2   : > { %v1865_v53 = vmax.f32 %v1786_v44, 0.0 }
 0x1e3   : > { %v1102_v12 = vpop.permute.xlu1 %1101  ;;  %v1404_v27 = vrot.slane %v1358_v5, 1  ;;  %v1367_v24 = vshll.u32 %v1358_v5, 16 }
 0x1e4   : > { %v1453_v25 = vsel %vm579_vm2, %v2971_v29, %v1102_v12  ;;  %v1898_v37 = vmul.f32 %v3269_v19, %v1865_v53 }
 0x1e5   : > { %v3284_v57 = vsel %vm1470_vm8, %v1453_v25, %v1183_v42  ;;  %1418 = vrot.lane.b32.xlu0 %v3048_v54, %s2343_s23  ;;  %v1403_v42 = vrot.slane %v1323_v0, 1  ;;  %v1369_v33 = vrot.slane %v1367_v24, 1 }
 0x1e6   : > { %1235 = vrot.lane.b32.xlu2 %v3193_v4, %s2341_s16  ;;  %v1931_v36 = vadd.f32 %v3278_v63, %v1898_v37 }
 0x1e7   : > { %v1787_v6 = vpop.f32.mrf.mxu1  ;;  %v1185_v59 = vpop.permute.xlu0 %1184  ;;  %v1405_v47 = vsel %vm1119_vm6, %v1403_v42, %v1404_v27  ;;  %v1370_v45 = vsel %vm894_vm5, %v1365_v13, %v1369_v33 }
 0x1e8   : > { %1963 = vst.msk [vmem:[%s3291_s13] sm:$0xff] %vm1536_vm10, %v1931_v36  ;;  %v1788_v29 = vadd.f32 %v1787_v6, %v3259_v58  ;;  %v1214_v4 = vpop.permute.xlu2 %1213 }
 0x1e9   : > { %1317 = vrot.lane.b32.xlu1 %v1286_v51, %s2342_s17 }
 0x1ea   : > { %v1866_v26 = vmax.f32 %v1788_v29, 0.0 }
 0x1eb   : > { %v1187_v20 = vpop.permute.xlu1 %1186 }
 0x1ec   : > { %v1899_v62 = vmul.f32 %v3269_v19, %v1866_v26 }
 0x1ed   : > { %1282 = vrot.lane.b32.xlu0 %v3222_v30, %s2344_s25  ;;  %v1455_v30 = vsel %vm579_vm2, %v2998_v11, %v3230_v32 }
 0x1ee   : > { %1354 = vrot.lane.b32.xlu2 %v1323_v0, %s2345_s26  ;;  %v1932_v51 = vadd.f32 %v3278_v63, %v1899_v62  ;;  %v1488_v56 = vsel %vm1470_vm8, %v1455_v30, %v1185_v59 }
 0x1ef   : > { %v1106_v14 = vpop.permute.xlu0 %1105  ;;  %v1521_v61 = vsel %vm1503_vm9, %v1488_v56, %v3247_v16 }
 0x1f0   : > { %1964 = vst.msk [vmem:[%s3291_s13 + $0x8] sm:$0xff] %vm1536_vm10, %v1932_v51  ;;  %v1333_v44 = vpop.permute.xlu2 %1332  ;;  %v1457_v7 = vsel %vm579_vm2, %v3026_v39, %v1106_v14 }
 0x1f1   : > { %1436 = vrot.lane.b32.xlu1 %v1405_v47, %s2343_s23  ;;  %v1490_v0 = vsel %vm1470_vm8, %v1457_v7, %v1187_v20 }
 0x1f2   : > { %v1523_v5 = vsel %vm1503_vm9, %v1490_v0, %v2801_v38 }
 0x1f3   : > { %v1304_v1 = vpop.permute.xlu1 %1303 }
 0x1f5   : > { %1401 = vrot.lane.b32.xlu0 %v1370_v45, %s2346_s30 }
 0x1f6   : > { %1219 = vrot.lane.b32.xlu2 %v2998_v11, %s2341_s16  ;;  %s2218_s16 = sshll.u32 %s2399_s22, 8 }
 0x1f7   : > { %v1269_v53 = vpop.permute.xlu0 %1268 }
 0x1f8   : > { %v1554_v12 = vsel %vm1536_vm10, %v1521_v61, %v1269_v53 }
 0x1f9   : > { %1301 = vrot.lane.b32.xlu1 %v3048_v54, %s2342_s17  ;;  %v1587_v32 = vsel %vm1569_vm11, %v1554_v12, %v1304_v1  ;;  %v3336_v54 = vpop.permute.xlu2 %1194 }
 0x1fa   : > { %v1620_v11 = vsel %vm1602_vm12, %v1587_v32, %v2777_v15 }
 0x1fb   : > { %v3323_v25 = vpop.permute.xlu1 %1430  ;;  %v1653_v37 = vsel %vm1635_vm13, %v1620_v11, %v2873_v50  ;;  %v1556_v50 = vsel %vm1536_vm10, %v1523_v5, %v2896_v52 }
 0x1fc   : > { %v1686_v16 = vsel %vm1668_vm14, %v1653_v37, %v2838_v23  ;;  %v1589_v38 = vsel %vm1569_vm11, %v1556_v50, %v2862_v34 }
 0x1fd   : > { %1266 = vrot.lane.b32.xlu0 %v3052_v8, %s2344_s25  ;;  %2184 = vmatmul.msk.bf16.vlgmr.msra.gmra.mxu2 %vm1739_vm15, %v1686_v16  ;;  %v1622_v8 = vsel %vm1602_vm12, %v1589_v38, %v2898_v10  ;;  %v3631_v38 = vld [vmem:[#allocation6_spill] sm:$0xff]  ;;  %s2007_s25 = scalar_lea.hbm %s3626_s5, %s2218_s16 }
 0x1fe   : > { %1338 = vrot.lane.b32.xlu2 %v3026_v39, %s2345_s26  ;;  %v1513_v39 = vsel %vm1503_vm9, %v3134_v40, %v1214_v4  ;;  %s2008_s26 = sshll.u32 %s3291_s13, 4  ;;  %s2010_s22 = sshll.u32 %s2007_s25, 4  ;;  %s2009_s26 = int_to_ptr.vmem [resolvable:$true] %s2008_s26  ;;  %s2011_s22 = int_to_ptr.hbm [resolvable:$true] %s2010_s22 }
 0x1ff   : > { %v1396_v15 = vpop.permute.xlu0 %1395  ;;  %s2288_s14 = sshra.s32 %s2011_s22, 4  ;;  %s2289_s14 = int_to_ptr.hbm [resolvable:$true] %s2288_s14 }
 0x200   : > { %v1661_v37 = vsel %vm1635_vm13, %v3274_v3, %v1396_v15  ;;  %s2290_s15 = scalar_lea.hbm %s2289_s14, 256  ;;  %p2295_p0 = scmp.lt.s32.totalorder %s2289_s14, %s3626_s5 }
 0x201   : > { %1420 = vrot.lane.b32.xlu1 %v3062_v2, %s2343_s23  ;;  %v3352_v46 = vpop.permute.xlu2 %1313  ;;  %v1655_v2 = vsel %vm1635_vm13, %v1622_v8, %v3059_v9  ;;  %v1465_v8 = vsel %vm579_vm2, %v3631_v38, %v3219_v41  ;;  %p2291_p11 = scmp.ne.s32.totalorder %s2289_s14, %s2290_s15  ;;  %p2296_p1 = scmp.lt.s32.totalorder %s2294_s8, %s2290_s15 }
 0x203   : > { %v1296_v23 = vpop.permute.xlu1 %1295  ;;  %p2292_p12 = pnand %p2291_p11, %p2416_p5  ;;  %p2297_p2 = por %p2296_p1, %p2295_p0 }
 0x205   : > { %1385 = vrot.lane.b32.xlu0 %v3067_v18, %s2346_s30  ;;  %v1688_v18 = vsel %vm1668_vm14, %v1655_v2, %v2987_v60  ;;  %s1996_s30 = scalar_lea.sflag [#allocation4], %s215_s10  ;;  %p2293_p13 = pneg %p2292_p12 }
 0x207   : > { %v1261_v36 = vpop.permute.xlu0 %1260  ;;  %p2298_p3 = pnand %p2297_p2, %p2293_p13 }
 0x208   : > { %v1546_v52 = vsel %vm1536_vm10, %v1513_v39, %v1261_v36  ;;  %v1498_v36 = vsel %vm1470_vm8, %v1465_v8, %v3336_v54 }
 0x209   : > { %v1579_v34 = vsel %vm1569_vm11, %v1546_v52, %v1296_v23  ;;  %v3365_v9 = vpop.permute.xlu2 %1432  ;;  %v1694_v23 = vsel %vm1668_vm14, %v1661_v37, %v3323_v25 }
 0x20a   : > { %v1612_v59 = vsel %vm1602_vm12, %v1579_v34, %v1333_v44 }
 0x20b   : > { %v1415_v6 = vpop.permute.xlu1 %1414 }
 0x20d   : > { %2185 = vmatmul.msk.bf16.gmra.mxu2 %vm1739_vm15, %v1688_v18 }
 0x20f   : > { %v1790_v10 = vpop.f32.mrf.mxu1  ;;  %v1380_v40 = vpop.permute.xlu0 %1379 }
 0x210   : > { %v1791_v29 = vadd.f32 %v1790_v10, %v3259_v58  ;;  %v1645_v42 = vsel %vm1635_vm13, %v1612_v59, %v1380_v40 }
 0x211   : > { %v1678_v27 = vsel %vm1668_vm14, %v1645_v42, %v1415_v6  ;;  %v1298_v51 = vpop.permute.xlu2 %1297 }
 0x212   : > { %v1867_v26 = vmax.f32 %v1791_v29, 0.0  ;;  %2180 = vmatmul.msk.bf16.gmra.mxu1 %vm1739_vm15, %v1678_v27 }
 0x213   : > { %v1279_v60 = vpop.permute.xlu1 %1278 }
 0x214   : > { %v1900_v4 = vmul.f32 %v3269_v19, %v1867_v26 }
 0x216   : > { %v1933_v20 = vadd.f32 %v3278_v63, %v1900_v4 }
 0x217   : > { %v1792_v35 = vpop.f32.mrf.mxu1  ;;  %v1232_v55 = vpop.permute.xlu0 %1231 }
 0x218   : > { %1965 = vst.msk [vmem:[%s3291_s13 + $0x10] sm:$0xff] %vm1536_vm10, %v1933_v20  ;;  %v1793_v24 = vadd.f32 %v1792_v35, %v3259_v58  ;;  %v1531_v3 = vsel %vm1503_vm9, %v1498_v36, %v1232_v55 }
 0x219   : > { %v1417_v45 = vpop.permute.xlu2 %1416  ;;  %v1564_v2 = vsel %vm1536_vm10, %v1531_v3, %v1279_v60 }
 0x21a   : > { %v1868_v62 = vmax.f32 %v1793_v24, 0.0  ;;  %v1597_v54 = vsel %vm1569_vm11, %v1564_v2, %v3352_v46  ;;  %v1467_v46 = vsel %vm579_vm2, %v2922_v21, %v3200_v22 }
 0x21b   : > { %v1398_v47 = vpop.permute.xlu1 %1397 }
 0x21c   : > { %v1901_v13 = vmul.f32 %v3269_v19, %v1868_v62 }
 0x21d   : > { %2186 = vmatmul.msk.bf16.gmra.mxu2 %vm1739_vm15, %v3151_v28 }
 0x21e   : > { %v1934_v33 = vadd.f32 %v3278_v63, %v1901_v13 }
 0x21f   : > { %v1351_v14 = vpop.permute.xlu0 %1350 }
 0x220   : > { %1966 = vst.msk [vmem:[%s3291_s13 + $0x18] sm:$0xff] %vm1536_vm10, %v1934_v33  ;;  %v1630_v10 = vsel %vm1602_vm12, %v1597_v54, %v1351_v14 }
 0x221   : > { %v1281_v53 = vpop.permute.xlu2 %1280  ;;  %v1663_v42 = vsel %vm1635_vm13, %v1630_v10, %v1398_v47 }
 0x222   : > { %v1696_v60 = vsel %vm1668_vm14, %v1663_v42, %v3365_v9 }
 0x223   : > { %v1263_v1 = vpop.permute.xlu1 %1262 }
 0x227   : > { %v1216_v30 = vpop.permute.xlu0 %1215 }
 0x228   : > { %v1515_v56 = vsel %vm1503_vm9, %v3215_v48, %v1216_v30 }
 0x229   : > { %v1548_v7 = vsel %vm1536_vm10, %v1515_v56, %v1263_v1  ;;  %v1400_v16 = vpop.permute.xlu2 %1399 }
 0x22a   : > { %v1581_v61 = vsel %vm1569_vm11, %v1548_v7, %v1298_v51 }
 0x22b   : > { %v1382_v44 = vpop.permute.xlu1 %1381 }
 0x22d   : > { %2187 = vmatmul.msk.bf16.gmra.mxu2 %vm1739_vm15, %v3185_v43 }
 0x22f   : > { %v1335_v28 = vpop.permute.xlu0 %1334 }
 0x230   : > { %v1614_v12 = vsel %vm1602_vm12, %v1581_v61, %v1335_v28 }
 0x231   : > { %v1647_v32 = vsel %vm1635_vm13, %v1614_v12, %v1382_v44  ;;  %v1265_v18 = vpop.permute.xlu2 %1264 }
 0x232   : > { %v1680_v11 = vsel %vm1668_vm14, %v1647_v32, %v1417_v45 }
 0x233   : > { %v1234_v0 = vpop.permute.xlu1 %1233  ;;  %2181 = vmatmul.msk.bf16.gmra.mxu1 %vm1739_vm15, %v1680_v11 }
 0x237   : > { %v1197_v48 = vpop.permute.xlu0 %1196 }
 0x238   : > { %v1500_v20 = vsel %vm1470_vm8, %v1467_v46, %v1197_v48 }
 0x239   : > { %v1384_v35 = vpop.permute.xlu2 %1383  ;;  %v1533_v62 = vsel %vm1503_vm9, %v1500_v20, %v1234_v0  ;;  %v1469_v0 = vsel %vm579_vm2, %v2961_v31, %v3266_v17 }
 0x23a   : > { %v1566_v13 = vsel %vm1536_vm10, %v1533_v62, %v1281_v53 }
 0x23b   : > { %v1353_v5 = vpop.permute.xlu1 %1352  ;;  %v1795_v43 = vpop.f32.mrf.mxu1 }
 0x23c   : > { %v1796_v50 = vadd.f32 %v1795_v43, %v3259_v58 }
 0x23d   : > { %2188 = vmatmul.msk.bf16.gmra.mxu2 %vm1739_vm15, %v1694_v23 }
 0x23e   : > { %v1869_v39 = vmax.f32 %v1796_v50, 0.0 }
 0x23f   : > { %v1316_v15 = vpop.permute.xlu0 %1315 }
 0x240   : > { %v1902_v52 = vmul.f32 %v3269_v19, %v1869_v39 }
 0x241   : > { %v1236_v30 = vpop.permute.xlu2 %1235 }
 0x242   : > { %v1935_v25 = vadd.f32 %v3278_v63, %v1902_v52 }
 0x243   : > { %v1218_v6 = vpop.permute.xlu1 %1217  ;;  %v1797_v34 = vpop.f32.mrf.mxu1 }
 0x244   : > { %1967 = vst.msk [vmem:[%s3291_s13 + $0x20] sm:$0xff] %vm1536_vm10, %v1935_v25  ;;  %v1798_v41 = vadd.f32 %v1797_v34, %v3259_v58  ;;  %v1517_v4 = vsel %vm1503_vm9, %v3257_v49, %v1218_v6  ;;  %v1599_v49 = vsel %vm1569_vm11, %v1566_v13, %v1316_v15 }
 0x245   : > { %v1550_v24 = vsel %vm1536_vm10, %v1517_v4, %v1265_v18  ;;  %v1632_v45 = vsel %vm1602_vm12, %v1599_v49, %v1353_v5 }
 0x246   : > { %v1870_v59 = vmax.f32 %v1798_v41, 0.0  ;;  %v1665_v53 = vsel %vm1635_vm13, %v1632_v45, %v1400_v16 }
 0x247   : > { %v1435_v40 = vpop.permute.xlu0 %1434 }
 0x248   : > { %v1903_v29 = vmul.f32 %v3269_v19, %v1870_v59  ;;  %v1698_v32 = vsel %vm1668_vm14, %v1665_v53, %v1435_v40 }
 0x249   : > { %v1355_v43 = vpop.permute.xlu2 %1354 }
 0x24a   : > { %v1936_v27 = vadd.f32 %v3278_v63, %v1903_v29 }
 0x24b   : > { %v1337_v26 = vpop.permute.xlu1 %1336 }
 0x24c   : > { %1968 = vst.msk [vmem:[%s3291_s13 + $0x28] sm:$0xff] %vm1536_vm10, %v1936_v27 }
 0x24d   : > { %2189 = vmatmul.msk.bf16.gmra.mxu2 %vm1739_vm15, %v1696_v60 }
 0x24f   : > { %v1300_v55 = vpop.permute.xlu0 %1299 }
 0x250   : > { %v1583_v47 = vsel %vm1569_vm11, %v1550_v24, %v1300_v55 }
 0x251   : > { %v1616_v21 = vsel %vm1602_vm12, %v1583_v47, %v1337_v26  ;;  %v1220_v39 = vpop.permute.xlu2 %1219 }
 0x252   : > { %v1649_v1 = vsel %vm1635_vm13, %v1616_v21, %v1384_v35  ;;  %v1519_v2 = vsel %vm1503_vm9, %v3284_v57, %v1220_v39 }
 0x253   : > { %v1199_v9 = vpop.permute.xlu1 %1198 }
 0x254   : > { %v1800_v51 = vpop.f32.mrf.mxu1  ;;  %v1502_v11 = vsel %vm1470_vm8, %v1469_v0, %v1199_v9 }
 0x255   : > { %v1801_v22 = vadd.f32 %v1800_v51, %v3259_v58  ;;  %v1535_v16 = vsel %vm1503_vm9, %v1502_v11, %v1236_v30 }
 0x257   : > { %v1871_v33 = vmax.f32 %v1801_v22, 0.0  ;;  %v1419_v14 = vpop.permute.xlu0 %1418 }
 0x258   : > { %v1682_v44 = vsel %vm1668_vm14, %v1649_v1, %v1419_v14 }
 0x259   : > { %v1904_v56 = vmul.f32 %v3269_v19, %v1871_v33  ;;  %2182 = vmatmul.msk.bf16.gmra.mxu1 %vm1739_vm15, %v1682_v44  ;;  %v1339_v34 = vpop.permute.xlu2 %1338 }
 0x25b   : > { %v1937_v7 = vadd.f32 %v3278_v63, %v1904_v56  ;;  %v1318_v61 = vpop.permute.xlu1 %1317 }
 0x25c   : > { %v1802_v28 = vpop.f32.mrf.mxu1 }
 0x25d   : > { %1969 = vst.msk [vmem:[%s3291_s13 + $0x30] sm:$0xff] %vm1536_vm10, %v1937_v7  ;;  %v1803_v12 = vadd.f32 %v1802_v28, %v3259_v58  ;;  %2190 = vmatmul.msk.bf16.gmra.mxu2 %vm1739_vm15, %v1698_v32 }
 0x25f   : > { %v1872_v48 = vmax.f32 %v1803_v12, 0.0  ;;  %v1283_v37 = vpop.permute.xlu0 %1282 }
 0x260   : > { %v1568_v23 = vsel %vm1536_vm10, %v1535_v16, %v1283_v37 }
 0x261   : > { %v1905_v5 = vmul.f32 %v3269_v19, %v1872_v48  ;;  %v1601_v31 = vsel %vm1569_vm11, %v1568_v23, %v1318_v61 }
 0x262   : > { %v1634_v8 = vsel %vm1602_vm12, %v1601_v31, %v1355_v43 }
 0x263   : > { %v1938_v50 = vadd.f32 %v3278_v63, %v1905_v5  ;;  %v1437_v38 = vpop.permute.xlu1 %1436 }
 0x265   : > { %1970 = vst.msk [vmem:[%s3291_s13 + $0x38] sm:$0xff] %vm1536_vm10, %v1938_v50 }
 0x267   : > { %v1402_v17 = vpop.permute.xlu0 %1401 }
 0x268   : > { %v1667_v36 = vsel %vm1635_vm13, %v1634_v8, %v1402_v17 }
 0x269   : > { %v1700_v3 = vsel %vm1668_vm14, %v1667_v36, %v1437_v38 }
 0x26b   : > { %v1302_v15 = vpop.permute.xlu1 %1301 }
 0x26d   : > { %2191 = vmatmul.msk.bf16.gmra.mxu2 %vm1739_vm15, %v1700_v3 }
 0x26f   : > { %v1267_v52 = vpop.permute.xlu0 %1266 }
 0x270   : > { %v1552_v25 = vsel %vm1536_vm10, %v1519_v2, %v1267_v52 }
 0x271   : > { %v1585_v6 = vsel %vm1569_vm11, %v1552_v25, %v1302_v15 }
 0x272   : > { %v1618_v18 = vsel %vm1602_vm12, %v1585_v6, %v1339_v34 }
 0x273   : > { %v1421_v54 = vpop.permute.xlu1 %1420 }
 0x277   : > { %v1386_v41 = vpop.permute.xlu0 %1385 }
 0x278   : > { %v1651_v10 = vsel %vm1635_vm13, %v1618_v18, %v1386_v41 }
 0x279   : > { %v1684_v59 = vsel %vm1668_vm14, %v1651_v10, %v1421_v54 }
 0x27a   : > { %2183 = vmatmul.msk.bf16.gmra.mxu1 %vm1739_vm15, %v1684_v59 }
 0x280   : > { %v1825_v40 = vpop.f32.mrf.mxu2 }
 0x281   : > { %v1826_v57 = vadd.f32 %v1825_v40, %v3259_v58 }
 0x283   : > { %v1881_v29 = vmax.f32 %v1826_v57, 0.0 }
 0x285   : > { %v1914_v42 = vmul.f32 %v3269_v19, %v1881_v29 }
 0x287   : > { %v1947_v27 = vadd.f32 %v3278_v63, %v1914_v42 }
 0x288   : > { %v1827_v26 = vpop.f32.mrf.mxu2 }
 0x289   : > { %1979 = vst.msk [vmem:[%s3291_s13 + $0x80] sm:$0xff] %vm1536_vm10, %v1947_v27  ;;  %v1828_v60 = vadd.f32 %v1827_v26, %v3259_v58 }
 0x28b   : > { %v1882_v46 = vmax.f32 %v1828_v60, 0.0 }
 0x28d   : > { %v1915_v4 = vmul.f32 %v3269_v19, %v1882_v46 }
 0x28f   : > { %v1948_v20 = vadd.f32 %v3278_v63, %v1915_v4  ;;  %v1805_v35 = vpop.f32.mrf.mxu1 }
 0x290   : > { %v1806_v55 = vadd.f32 %v1805_v35, %v3259_v58  ;;  %v1830_v24 = vpop.f32.mrf.mxu2 }
 0x291   : > { %1980 = vst.msk [vmem:[%s3291_s13 + $0x88] sm:$0xff] %vm1536_vm10, %v1948_v20  ;;  %v1831_v62 = vadd.f32 %v1830_v24, %v3259_v58 }
 0x292   : > { %v1873_v47 = vmax.f32 %v1806_v55, 0.0 }
 0x293   : > { %v1883_v9 = vmax.f32 %v1831_v62, 0.0 }
 0x294   : > { %v1906_v51 = vmul.f32 %v3269_v19, %v1873_v47 }
 0x295   : > { %v1916_v13 = vmul.f32 %v3269_v19, %v1883_v9 }
 0x296   : > { %v1939_v21 = vadd.f32 %v3278_v63, %v1906_v51 }
 0x297   : > { %v1949_v22 = vadd.f32 %v3278_v63, %v1916_v13  ;;  %v1807_v49 = vpop.f32.mrf.mxu1 }
 0x298   : > { %1971 = vst.msk [vmem:[%s3291_s13 + $0x40] sm:$0xff] %vm1536_vm10, %v1939_v21  ;;  %v1808_v33 = vadd.f32 %v1807_v49, %v3259_v58  ;;  %v1832_v14 = vpop.f32.mrf.mxu2 }
 0x299   : > { %1981 = vst.msk [vmem:[%s3291_s13 + $0x90] sm:$0xff] %vm1536_vm10, %v1949_v22  ;;  %v1833_v1 = vadd.f32 %v1832_v14, %v3259_v58 }
 0x29a   : > { %v1874_v45 = vmax.f32 %v1808_v33, 0.0 }
 0x29b   : > { %v1884_v30 = vmax.f32 %v1833_v1, 0.0 }
 0x29c   : > { %v1907_v56 = vmul.f32 %v3269_v19, %v1874_v45 }
 0x29d   : > { %v1917_v44 = vmul.f32 %v3269_v19, %v1884_v30 }
 0x29e   : > { %v1940_v7 = vadd.f32 %v3278_v63, %v1907_v56 }
 0x29f   : > { %v1950_v61 = vadd.f32 %v3278_v63, %v1917_v44 }
 0x2a0   : > { %1972 = vst.msk [vmem:[%s3291_s13 + $0x48] sm:$0xff] %vm1536_vm10, %v1940_v7  ;;  %v1835_v28 = vpop.f32.mrf.mxu2 }
 0x2a1   : > { %1982 = vst.msk [vmem:[%s3291_s13 + $0x98] sm:$0xff] %vm1536_vm10, %v1950_v61  ;;  %v1836_v53 = vadd.f32 %v1835_v28, %v3259_v58 }
 0x2a3   : > { %v1885_v12 = vmax.f32 %v1836_v53, 0.0 }
 0x2a5   : > { %v1918_v32 = vmul.f32 %v3269_v19, %v1885_v12 }
 0x2a7   : > { %v1951_v0 = vadd.f32 %v3278_v63, %v1918_v32 }
 0x2a8   : > { %v1837_v11 = vpop.f32.mrf.mxu2 }
 0x2a9   : > { %1983 = vst.msk [vmem:[%s3291_s13 + $0xa0] sm:$0xff] %vm1536_vm10, %v1951_v0  ;;  %v1838_v48 = vadd.f32 %v1837_v11, %v3259_v58 }
 0x2ab   : > { %v1886_v37 = vmax.f32 %v1838_v48, 0.0 }
 0x2ad   : > { %v1919_v5 = vmul.f32 %v3269_v19, %v1886_v37 }
 0x2af   : > { %v1952_v16 = vadd.f32 %v3278_v63, %v1919_v5 }
 0x2b0   : > { %v1810_v43 = vpop.f32.mrf.mxu1  ;;  %v1840_v50 = vpop.f32.mrf.mxu2 }
 0x2b1   : > { %1984 = vst.msk [vmem:[%s3291_s13 + $0xa8] sm:$0xff] %vm1536_vm10, %v1952_v16  ;;  %v1811_v23 = vadd.f32 %v1810_v43, %v3259_v58  ;;  %v1841_v38 = vadd.f32 %v1840_v50, %v3259_v58 }
 0x2b3   : > { %v1875_v31 = vmax.f32 %v1811_v23, 0.0  ;;  %v1887_v17 = vmax.f32 %v1841_v38, 0.0 }
 0x2b5   : > { %v1908_v8 = vmul.f32 %v3269_v19, %v1875_v31  ;;  %v1920_v36 = vmul.f32 %v3269_v19, %v1887_v17 }
 0x2b7   : > { %v1941_v39 = vadd.f32 %v3278_v63, %v1908_v8  ;;  %v1953_v3 = vadd.f32 %v3278_v63, %v1920_v36 }
 0x2b8   : > { %v1812_v15 = vpop.f32.mrf.mxu1  ;;  %v1842_v52 = vpop.f32.mrf.mxu2 }
 0x2b9   : > { %1973 = vst.msk [vmem:[%s3291_s13 + $0x50] sm:$0xff] %vm1536_vm10, %v1941_v39  ;;  %v1813_v2 = vadd.f32 %v1812_v15, %v3259_v58  ;;  %v1843_v25 = vadd.f32 %v1842_v52, %v3259_v58 }
 0x2ba   : > { %1985 = vst.msk [vmem:[%s3291_s13 + $0xb0] sm:$0xff] %vm1536_vm10, %v1953_v3 }
 0x2bb   : > { %v1876_v6 = vmax.f32 %v1813_v2, 0.0  ;;  %v1888_v34 = vmax.f32 %v1843_v25, 0.0 }
 0x2bd   : > { %v1909_v18 = vmul.f32 %v3269_v19, %v1876_v6  ;;  %v1921_v41 = vmul.f32 %v3269_v19, %v1888_v34 }
 0x2bf   : > { %v1942_v54 = vadd.f32 %v3278_v63, %v1909_v18  ;;  %v1954_v10 = vadd.f32 %v3278_v63, %v1921_v41 }
 0x2c0   : > { %v1845_v59 = vpop.f32.mrf.mxu2 }
 0x2c1   : > { %1974 = vst.msk [vmem:[%s3291_s13 + $0x58] sm:$0xff] %vm1536_vm10, %v1942_v54  ;;  %v1846_v40 = vadd.f32 %v1845_v59, %v3259_v58 }
 0x2c2   : > { %1986 = vst.msk [vmem:[%s3291_s13 + $0xb8] sm:$0xff] %vm1536_vm10, %v1954_v10 }
 0x2c3   : > { %v1889_v57 = vmax.f32 %v1846_v40, 0.0 }
 0x2c5   : > { %v1922_v29 = vmul.f32 %v3269_v19, %v1889_v57 }
 0x2c7   : > { %v1955_v42 = vadd.f32 %v3278_v63, %v1922_v29 }
 0x2c8   : > { %v1847_v27 = vpop.f32.mrf.mxu2 }
 0x2c9   : > { %1987 = vst.msk [vmem:[%s3291_s13 + $0xc0] sm:$0xff] %vm1536_vm10, %v1955_v42  ;;  %v1848_v26 = vadd.f32 %v1847_v27, %v3259_v58 }
 0x2cb   : > { %v1890_v60 = vmax.f32 %v1848_v26, 0.0 }
 0x2cd   : > { %v1923_v46 = vmul.f32 %v3269_v19, %v1890_v60 }
 0x2cf   : > { %v1956_v4 = vadd.f32 %v3278_v63, %v1923_v46 }
 0x2d0   : > { %v1850_v20 = vpop.f32.mrf.mxu2 }
 0x2d1   : > { %1988 = vst.msk [vmem:[%s3291_s13 + $0xc8] sm:$0xff] %vm1536_vm10, %v1956_v4  ;;  %v1851_v35 = vadd.f32 %v1850_v20, %v3259_v58 }
 0x2d3   : > { %v1891_v55 = vmax.f32 %v1851_v35, 0.0 }
 0x2d5   : > { %v1924_v24 = vmul.f32 %v3269_v19, %v1891_v55 }
 0x2d6   : > { %v1815_v62 = vpop.f32.mrf.mxu1 }
 0x2d7   : > { %v1957_v47 = vadd.f32 %v3278_v63, %v1924_v24  ;;  %v1816_v9 = vadd.f32 %v1815_v62, %v3259_v58 }
 0x2d8   : > { %v1852_v51 = vpop.f32.mrf.mxu2 }
 0x2d9   : > { %1989 = vst.msk [vmem:[%s3291_s13 + $0xd0] sm:$0xff] %vm1536_vm10, %v1957_v47  ;;  %v1877_v13 = vmax.f32 %v1816_v9, 0.0  ;;  %v1853_v21 = vadd.f32 %v1852_v51, %v3259_v58 }
 0x2db   : > { %v1910_v22 = vmul.f32 %v3269_v19, %v1877_v13  ;;  %v1892_v49 = vmax.f32 %v1853_v21, 0.0 }
 0x2dd   : > { %v1943_v33 = vadd.f32 %v3278_v63, %v1910_v22  ;;  %v1925_v14 = vmul.f32 %v3269_v19, %v1892_v49 }
 0x2de   : > { %v1817_v1 = vpop.f32.mrf.mxu1 }
 0x2df   : > { %1975 = vst.msk [vmem:[%s3291_s13 + $0x60] sm:$0xff] %vm1536_vm10, %v1943_v33  ;;  %v1958_v45 = vadd.f32 %v3278_v63, %v1925_v14  ;;  %v1818_v30 = vadd.f32 %v1817_v1, %v3259_v58 }
 0x2e0   : > { %v1855_v56 = vpop.f32.mrf.mxu2 }
 0x2e1   : > { %1990 = vst.msk [vmem:[%s3291_s13 + $0xd8] sm:$0xff] %vm1536_vm10, %v1958_v45  ;;  %v1878_v44 = vmax.f32 %v1818_v30, 0.0  ;;  %v1856_v7 = vadd.f32 %v1855_v56, %v3259_v58 }
 0x2e3   : > { %v1911_v61 = vmul.f32 %v3269_v19, %v1878_v44  ;;  %v1893_v28 = vmax.f32 %v1856_v7, 0.0 }
 0x2e5   : > { %v1944_v53 = vadd.f32 %v3278_v63, %v1911_v61  ;;  %v1926_v12 = vmul.f32 %v3269_v19, %v1893_v28 }
 0x2e7   : > { %1976 = vst.msk [vmem:[%s3291_s13 + $0x68] sm:$0xff] %vm1536_vm10, %v1944_v53  ;;  %v1959_v32 = vadd.f32 %v3278_v63, %v1926_v12 }
 0x2e8   : > { %v1857_v0 = vpop.f32.mrf.mxu2 }
 0x2e9   : > { %1991 = vst.msk [vmem:[%s3291_s13 + $0xe0] sm:$0xff] %vm1536_vm10, %v1959_v32  ;;  %v1858_v11 = vadd.f32 %v1857_v0, %v3259_v58 }
 0x2eb   : > { %v1894_v48 = vmax.f32 %v1858_v11, 0.0 }
 0x2ed   : > { %v1927_v37 = vmul.f32 %v3269_v19, %v1894_v48 }
 0x2ef   : > { %v1960_v5 = vadd.f32 %v3278_v63, %v1927_v37 }
 0x2f0   : > { %v1860_v16 = vpop.f32.mrf.mxu2 }
 0x2f1   : > { %1992 = vst.msk [vmem:[%s3291_s13 + $0xe8] sm:$0xff] %vm1536_vm10, %v1960_v5  ;;  %v1861_v43 = vadd.f32 %v1860_v16, %v3259_v58 }
 0x2f3   : > { %v1895_v50 = vmax.f32 %v1861_v43, 0.0 }
 0x2f5   : > { %v1928_v23 = vmul.f32 %v3269_v19, %v1895_v50 }
 0x2f7   : > { %v1961_v38 = vadd.f32 %v3278_v63, %v1928_v23  ;;  %v1820_v31 = vpop.f32.mrf.mxu1 }
 0x2f8   : > { %v1821_v17 = vadd.f32 %v1820_v31, %v3259_v58  ;;  %v1862_v8 = vpop.f32.mrf.mxu2 }
 0x2f9   : > { %1993 = vst.msk [vmem:[%s3291_s13 + $0xf0] sm:$0xff] %vm1536_vm10, %v1961_v38  ;;  %v1863_v36 = vadd.f32 %v1862_v8, %v3259_v58 }
 0x2fa   : > { %v1879_v39 = vmax.f32 %v1821_v17, 0.0 }
 0x2fb   : > { %v1896_v3 = vmax.f32 %v1863_v36, 0.0 }
 0x2fc   : > { %v1912_v15 = vmul.f32 %v3269_v19, %v1879_v39 }
 0x2fd   : > { %v1929_v52 = vmul.f32 %v3269_v19, %v1896_v3 }
 0x2fe   : > { %v1945_v2 = vadd.f32 %v3278_v63, %v1912_v15 }
 0x2ff   : > { %v1962_v25 = vadd.f32 %v3278_v63, %v1929_v52  ;;  %v1822_v6 = vpop.f32.mrf.mxu1 }
 0x300   : > { %1977 = vst.msk [vmem:[%s3291_s13 + $0x70] sm:$0xff] %vm1536_vm10, %v1945_v2  ;;  %v1823_v34 = vadd.f32 %v1822_v6, %v3259_v58 }
 0x301   : > { %1994 = vst.msk [vmem:[%s3291_s13 + $0xf8] sm:$0xff] %vm1536_vm10, %v1962_v25 }
 0x302   : > { %v1880_v18 = vmax.f32 %v1823_v34, 0.0 }
 0x304   : > { %v1913_v41 = vmul.f32 %v3269_v19, %v1880_v18 }
 0x306   : > { %v1946_v54 = vadd.f32 %v3278_v63, %v1913_v41 }
 0x308   : > { %1978 = vst.msk [vmem:[%s3291_s13 + $0x78] sm:$0xff] %vm1536_vm10, %v1946_v54 }
 0x309   : > { %2301 = shalt.err (!%p2298_p3)
}
 0x30a   : > { %s2347_s10 = smov 128  }
 0x30b   : > { %2225 = dma.vmem_to_hbm [thread:$0]  (%p2416_p5), %s2009_s26, 4096, %s2011_s22, %s1996_s30, %s2347_s10, %s2347_s10, %s2339_s12  }
 0x30c PF: > { %p2231_p4 = scmp.ge.s32.totalorder %s2336_s21, 2  ;;  %s2025_s13 = sand.u32 1, %s2324_s18  }
 0x30d   : > { %s2026_s16 = scalar_lea.sflag [#allocation4], %s2025_s13 }
 0x30e   : > { %p2228_p7 = pnand %p2231_p4, %p2420_p6 }
 0x310   : > { %p2229_p8 = pneg %p2228_p7 }
 0x312   : > { %2319 = dma.done.wait (%p2229_p8), %s2026_s16, 4096  }
 0x313   : > { %2321 = vsyncadd (%p2229_p8), %s2026_s16, 4294963200  ;;  %p15_p9 = scmp.ge.s32.totalorder %s2403_s24, 4   ;;  %s3632_s18 = smov %s2328_s19 }
 0x314   : > { %s3633_s19 = smov %s2332_s20  ;;  %s3634_s20 = smov %s2414_s27 }
 0x315   : > { %s3635_s21 = smov %s2403_s24  ;;  %17 = sbr.rel (!%p15_p9) target bundleno = 3 (0x3), region = 77 }
 0x31a   :  { %2032 = vsyncpa [#allocation4], 1 }
 0x31b   :  { %2034 = vsyncpa [#allocation4 + $0x1], 1 }

</bundles_post_ra>
